<compile_context>
chip_gen: v7x
topology: tpu7x:2x2x1
jax: 0.10.0
libtpu: 0.0.40
codegen_flags: <defaults>
</compile_context>

<pallas_src>
import jax
import jax.numpy as jnp
from jax import lax
from jax.experimental import pallas as pl
from jax.experimental.pallas import tpu as pltpu


_VMEM = pl.BlockSpec(memory_space=pltpu.MemorySpace.VMEM)


# ---------------------------------------------------------------------------
# Fused Pallas kernel: embedding gather -> multi-layer bi-RNN -> linear
# ---------------------------------------------------------------------------

def _make_fused_kernel(num_layers, seq_len, batch_p, hidden, vocab):
    S, B, H, V = seq_len, batch_p, hidden, vocab

    def kernel(*refs):
        # refs = (idx, emb,
        #         <layer 0: wih_f, wih_b, whh_f, whh_b, b_f, b_b>,
        #         <layer l>=1: wtop_f, wbot_f, wtop_b, wbot_b, whh_f, whh_b, b_f, b_b>,
        #         wfc_f, wfc_b, bfc, out)
        idx_ref, emb_ref = refs[0], refs[1]
        wfc_f_ref, wfc_b_ref, bfc_ref = refs[-4], refs[-3], refs[-2]
        out_ref = refs[-1]
        lrefs = list(refs[2:-4])

        layer_refs = []
        i = 0
        for l in range(num_layers):
            n = 6 if l == 0 else 8
            layer_refs.append(lrefs[i:i + n])
            i += n

        # ---- in-kernel embedding gather via one-hot matmul (exactly table[idx]) --
        idx = idx_ref[...]                                         # (S*B, 1) int32
        iota = lax.broadcasted_iota(jnp.int32, (S * B, V), 1)
        onehot = jnp.where(iota == idx, jnp.float32(1.0), jnp.float32(0.0))
        x = jnp.dot(onehot, emb_ref[...],
                    preferred_element_type=jnp.float32)            # (S*B, E)

        # ---- layer-0 input projections hoisted out of the recurrence ------------
        wih_f0, wih_b0, _, _, b_f0, b_b0 = layer_refs[0]
        xwf = jnp.dot(x, wih_f0[...], preferred_element_type=jnp.float32) + b_f0[...]
        xwb = jnp.dot(x, wih_b0[...], preferred_element_type=jnp.float32) + b_b0[...]
        # per-timestep (B, H) blocks, aligned to full sublane tiles (B == 8*k)
        xf_blk = [xwf[t * B:(t + 1) * B, :] for t in range(S)]
        xb_blk = [xwb[t * B:(t + 1) * B, :] for t in range(S)]

        h_f = None
        h_b = None
        for l in range(num_layers):
            last = (l == num_layers - 1)
            if l == 0:
                whh_f = layer_refs[0][2][...]
                whh_b = layer_refs[0][3][...]
            else:
                whh_f = layer_refs[l][4][...]
                whh_b = layer_refs[l][5][...]

            if not last:
                nxt = layer_refs[l + 1]
                wtop_f = nxt[0][...]
                wbot_f = nxt[1][...]
                wtop_b = nxt[2][...]
                wbot_b = nxt[3][...]
                b_fn = nxt[6][...]
                b_bn = nxt[7][...]
                nf_f = [None] * S   # out_f(t) @ wtop_f  -> next fwd input at t
                nf_b = [None] * S   # out_b(t) @ wbot_f  -> next fwd input at t
                nb_f = [None] * S   # out_f(t) @ wtop_b  -> next bwd input at t
                nb_b = [None] * S   # out_b(t) @ wbot_b  -> next bwd input at t

            h_f = None
            h_b = None
            for t in range(S):                       # fully unrolled (static seq)
                if t == 0:                           # zero initial state: skip dot
                    pf = xf_blk[0]
                    pb = xb_blk[S - 1]
                else:
                    pf = xf_blk[t] + jnp.dot(h_f, whh_f,
                                             preferred_element_type=jnp.float32)
                    pb = xb_blk[S - 1 - t] + jnp.dot(h_b, whh_b,
                                                     preferred_element_type=jnp.float32)
                h_f = jnp.tanh(pf)                   # fwd state at time t
                h_b = jnp.tanh(pb)                   # bwd state at time S-1-t
                if not last:
                    # fold next layer's input projection into this loop
                    nf_f[t] = jnp.dot(h_f, wtop_f, preferred_element_type=jnp.float32)
                    nb_f[t] = jnp.dot(h_f, wtop_b, preferred_element_type=jnp.float32)
                    nf_b[S - 1 - t] = jnp.dot(h_b, wbot_f,
                                              preferred_element_type=jnp.float32)
                    nb_b[S - 1 - t] = jnp.dot(h_b, wbot_b,
                                              preferred_element_type=jnp.float32)

            if not last:
                xf_blk = [nf_f[t] + nf_b[t] + b_fn for t in range(S)]
                xb_blk = [nb_f[t] + nb_b[t] + b_bn for t in range(S)]

        # classifier on [h_fwd_final | h_bwd_final] without lane concat
        out = (jnp.dot(h_f, wfc_f_ref[...], preferred_element_type=jnp.float32)
               + jnp.dot(h_b, wfc_b_ref[...], preferred_element_type=jnp.float32)
               + bfc_ref[...])
        out_ref[...] = out.astype(out_ref.dtype)

    return kernel


# ---------------------------------------------------------------------------
# Parameters
# ---------------------------------------------------------------------------

def init_params(key, vocab, emb_dim, hidden, out_dim, num_layers):
    params = {}
    key, k_emb = jax.random.split(key)
    params["embedding"] = jax.random.normal(k_emb, (vocab, emb_dim), jnp.float32)

    k = 1.0 / jnp.sqrt(hidden)
    layers = []
    for l in range(num_layers):
        in_dim = emb_dim if l == 0 else 2 * hidden
        layer = {}
        for d in ("fwd", "bwd"):
            key, k1, k2, k3, k4 = jax.random.split(key, 5)
            layer[d] = {
                # stored pre-transposed: (in, hidden) and (hidden, hidden)
                "w_ih_t": jax.random.uniform(k1, (in_dim, hidden), jnp.float32, -k, k),
                "w_hh_t": jax.random.uniform(k2, (hidden, hidden), jnp.float32, -k, k),
                "bias": (jax.random.uniform(k3, (1, hidden), jnp.float32, -k, k)
                         + jax.random.uniform(k4, (1, hidden), jnp.float32, -k, k)),
            }
        layers.append(layer)
    params["rnn"] = layers

    kf = 1.0 / jnp.sqrt(2 * hidden)
    key, k1, k2 = jax.random.split(key, 3)
    params["fc_w_t"] = jax.random.uniform(k1, (2 * hidden, out_dim), jnp.float32, -kf, kf)
    params["fc_b"] = jax.random.uniform(k2, (1, out_dim), jnp.float32, -kf, kf)
    return params


def prepare_kernel_inputs(params):
    """Build kernel-ready weight views ONCE (outside the per-call path)."""
    hidden = params["rnn"][0]["fwd"]["w_hh_t"].shape[0]
    inputs = [params["embedding"]]
    for l, layer in enumerate(params["rnn"]):
        f, b = layer["fwd"], layer["bwd"]
        if l == 0:
            inputs += [f["w_ih_t"], b["w_ih_t"],
                       f["w_hh_t"], b["w_hh_t"],
                       f["bias"], b["bias"]]
        else:
            inputs += [f["w_ih_t"][:hidden, :], f["w_ih_t"][hidden:, :],
                       b["w_ih_t"][:hidden, :], b["w_ih_t"][hidden:, :],
                       f["w_hh_t"], b["w_hh_t"],
                       f["bias"], b["bias"]]
    inputs += [params["fc_w_t"][:hidden, :], params["fc_w_t"][hidden:, :],
               params["fc_b"]]
    return tuple(inputs)


# ---------------------------------------------------------------------------
# Forward (one pallas_call; wrapper only pads/reshapes the int32 indices)
# ---------------------------------------------------------------------------

def rnn_forward(kernel_inputs, text):
    """kernel_inputs: prepare_kernel_inputs(params); text: (seq, batch) int32."""
    seq_len, batch = text.shape
    emb = kernel_inputs[0]
    vocab = emb.shape[0]
    hidden = kernel_inputs[3].shape[0]            # layer-0 whh_f
    out_dim = kernel_inputs[-1].shape[1]
    num_layers = 1 + (len(kernel_inputs) - 10) // 8
    assert len(kernel_inputs) == 10 + 8 * (num_layers - 1)

    # Pad batch to the f32 sublane tile (8) so every timestep block is aligned.
    B = ((batch + 7) // 8) * 8
    text_p = jnp.pad(text, ((0, 0), (0, B - batch)))          # pad rows -> index 0
    idx = text_p.reshape(seq_len * B, 1).astype(jnp.int32)

    kernel = _make_fused_kernel(num_layers, seq_len, B, hidden, vocab)
    logits_p = pl.pallas_call(
        kernel,
        out_shape=jax.ShapeDtypeStruct((B, out_dim), jnp.float32),
        in_specs=[_VMEM] * (1 + len(kernel_inputs)),
        out_specs=_VMEM,
    )(idx, *kernel_inputs)
    return logits_p[:batch]                                    # drop padded rows


# ---------------------------------------------------------------------------
# Plain-JAX reference (PyTorch nn.RNN(bidirectional=True) eval semantics)
# ---------------------------------------------------------------------------

def reference_forward(params, text):
    prec = lax.Precision.HIGHEST
    layer_in = params["embedding"][text]                       # (seq, batch, emb)
    h_f_fin = h_b_fin = None
    for layer in params["rnn"]:
        results = {}
        for d, xs in (("fwd", layer_in), ("bwd", layer_in[::-1])):
            w_ih_t = layer[d]["w_ih_t"]
            w_hh_t = layer[d]["w_hh_t"]
            bias = layer[d]["bias"]

            def step(h, x_t, w_ih_t=w_ih_t, w_hh_t=w_hh_t, bias=bias):
                h_new = jnp.tanh(jnp.dot(x_t, w_ih_t, precision=prec)
                                 + jnp.dot(h, w_hh_t, precision=prec) + bias)
                return h_new, h_new

            h0 = jnp.zeros((xs.shape[1], w_hh_t.shape[0]), jnp.float32)
            h_fin, hs = lax.scan(step, h0, xs)
            results[d] = (hs, h_fin)
        out_f, h_f_fin = results["fwd"]
        out_b_rev, h_b_fin = results["bwd"]
        layer_in = jnp.concatenate([out_f, out_b_rev[::-1]], axis=-1)
    hidden_cat = jnp.concatenate([h_f_fin, h_b_fin], axis=1)
    return jnp.dot(hidden_cat, params["fc_w_t"], precision=prec) + params["fc_b"]


# ---------------------------------------------------------------------------
# Main
# ---------------------------------------------------------------------------

if __name__ == "__main__":
    VOCAB = 50          # inputDimensions
    EMB = 32            # embeddingDimensions
    HIDDEN = 32         # hiddenDimensions
    OUT = 4             # outputDimensions
    NUM_LAYERS = 2      # numOfLayers
    SEQ = 8
    BATCH = 2

    key = jax.random.PRNGKey(0)
    key, k_text, k_params = jax.random.split(key, 3)

    text = jax.random.randint(k_text, (SEQ, BATCH), 0, VOCAB, dtype=jnp.int32)
    params = init_params(k_params, VOCAB, EMB, HIDDEN, OUT, NUM_LAYERS)

    # Weight views are materialized once, outside the per-call path.
    kinputs = prepare_kernel_inputs(params)

    fwd = jax.jit(rnn_forward)
    logits = jax.block_until_ready(fwd(kinputs, text))

    assert logits.shape == (BATCH, OUT)
    assert bool(jnp.all(jnp.isfinite(logits)))

    # Cross-check the fused kernel against a plain-JAX reference of the module.
    ref = reference_forward(params, text)
    assert bool(jnp.allclose(logits, ref, atol=1e-2, rtol=1e-2))

    print("KERNEL_OK")
</pallas_src>

<mosaic_0001>
module attributes {stable_mosaic.version = 11 : i64} {
  func.func @kernel(%arg0: memref<64x1xi32, #tpu.memory_space<vmem>>, %arg1: memref<50x32xf32, #tpu.memory_space<vmem>>, %arg2: memref<32x32xf32, #tpu.memory_space<vmem>>, %arg3: memref<32x32xf32, #tpu.memory_space<vmem>>, %arg4: memref<32x32xf32, #tpu.memory_space<vmem>>, %arg5: memref<32x32xf32, #tpu.memory_space<vmem>>, %arg6: memref<1x32xf32, #tpu.memory_space<vmem>>, %arg7: memref<1x32xf32, #tpu.memory_space<vmem>>, %arg8: memref<32x32xf32, #tpu.memory_space<vmem>>, %arg9: memref<32x32xf32, #tpu.memory_space<vmem>>, %arg10: memref<32x32xf32, #tpu.memory_space<vmem>>, %arg11: memref<32x32xf32, #tpu.memory_space<vmem>>, %arg12: memref<32x32xf32, #tpu.memory_space<vmem>>, %arg13: memref<32x32xf32, #tpu.memory_space<vmem>>, %arg14: memref<1x32xf32, #tpu.memory_space<vmem>>, %arg15: memref<1x32xf32, #tpu.memory_space<vmem>>, %arg16: memref<32x4xf32, #tpu.memory_space<vmem>>, %arg17: memref<32x4xf32, #tpu.memory_space<vmem>>, %arg18: memref<1x4xf32, #tpu.memory_space<vmem>>, %arg19: memref<8x4xf32, #tpu.memory_space<vmem>>) attributes {dimension_semantics = [], scalar_prefetch = 0 : i64, scratch_operands = 0 : i64, tpu.core_type = #tpu.core_type<tc>} {
    %c0 = arith.constant 0 : index
    %c0_0 = arith.constant 0 : index
    %0 = vector.load %arg0[%c0, %c0_0] : memref<64x1xi32, #tpu.memory_space<vmem>>, vector<64x1xi32>
    %1 = tpu.iota {dimensions = array<i32: 1>} : vector<64x50xi32>
    %2 = vector.broadcast %0 : vector<64x1xi32> to vector<64x50xi32>
    %3 = arith.cmpi eq, %1, %2 : vector<64x50xi32>
    %cst = arith.constant 1.000000e+00 : f32
    %cst_1 = arith.constant 0.000000e+00 : f32
    %4 = vector.broadcast %cst : f32 to vector<64x50xf32>
    %5 = vector.broadcast %cst_1 : f32 to vector<64x50xf32>
    %6 = arith.select %3, %4, %5 : vector<64x50xi1>, vector<64x50xf32>
    %c0_2 = arith.constant 0 : index
    %c0_3 = arith.constant 0 : index
    %7 = vector.load %arg1[%c0_2, %c0_3] : memref<50x32xf32, #tpu.memory_space<vmem>>, vector<50x32xf32>
    %cst_4 = arith.constant dense<0.000000e+00> : vector<64x32xf32>
    %8 = tpu.matmul %6, %7, %cst_4 {dimension_numbers = #tpu.dot_dimension_numbers<[1], [0], [0], [1], [0, 0, 1, 1], [], []>} : vector<64x50xf32>, vector<50x32xf32>, vector<64x32xf32> -> vector<64x32xf32>
    %c0_5 = arith.constant 0 : index
    %c0_6 = arith.constant 0 : index
    %9 = vector.load %arg2[%c0_5, %c0_6] : memref<32x32xf32, #tpu.memory_space<vmem>>, vector<32x32xf32>
    %cst_7 = arith.constant dense<0.000000e+00> : vector<64x32xf32>
    %10 = tpu.matmul %8, %9, %cst_7 {dimension_numbers = #tpu.dot_dimension_numbers<[1], [0], [0], [1], [0, 0, 1, 1], [], []>} : vector<64x32xf32>, vector<32x32xf32>, vector<64x32xf32> -> vector<64x32xf32>
    %c0_8 = arith.constant 0 : index
    %c0_9 = arith.constant 0 : index
    %11 = vector.load %arg6[%c0_8, %c0_9] : memref<1x32xf32, #tpu.memory_space<vmem>>, vector<1x32xf32>
    %12 = vector.broadcast %11 : vector<1x32xf32> to vector<64x32xf32>
    %13 = arith.addf %10, %12 : vector<64x32xf32>
    %c0_10 = arith.constant 0 : index
    %c0_11 = arith.constant 0 : index
    %14 = vector.load %arg3[%c0_10, %c0_11] : memref<32x32xf32, #tpu.memory_space<vmem>>, vector<32x32xf32>
    %cst_12 = arith.constant dense<0.000000e+00> : vector<64x32xf32>
    %15 = tpu.matmul %8, %14, %cst_12 {dimension_numbers = #tpu.dot_dimension_numbers<[1], [0], [0], [1], [0, 0, 1, 1], [], []>} : vector<64x32xf32>, vector<32x32xf32>, vector<64x32xf32> -> vector<64x32xf32>
    %c0_13 = arith.constant 0 : index
    %c0_14 = arith.constant 0 : index
    %16 = vector.load %arg7[%c0_13, %c0_14] : memref<1x32xf32, #tpu.memory_space<vmem>>, vector<1x32xf32>
    %17 = vector.broadcast %16 : vector<1x32xf32> to vector<64x32xf32>
    %18 = arith.addf %15, %17 : vector<64x32xf32>
    %19 = vector.extract_strided_slice %13 {offsets = [0, 0], sizes = [8, 32], strides = [1, 1]} : vector<64x32xf32> to vector<8x32xf32>
    %20 = vector.extract_strided_slice %13 {offsets = [8, 0], sizes = [8, 32], strides = [1, 1]} : vector<64x32xf32> to vector<8x32xf32>
    %21 = vector.extract_strided_slice %13 {offsets = [16, 0], sizes = [8, 32], strides = [1, 1]} : vector<64x32xf32> to vector<8x32xf32>
    %22 = vector.extract_strided_slice %13 {offsets = [24, 0], sizes = [8, 32], strides = [1, 1]} : vector<64x32xf32> to vector<8x32xf32>
    %23 = vector.extract_strided_slice %13 {offsets = [32, 0], sizes = [8, 32], strides = [1, 1]} : vector<64x32xf32> to vector<8x32xf32>
    %24 = vector.extract_strided_slice %13 {offsets = [40, 0], sizes = [8, 32], strides = [1, 1]} : vector<64x32xf32> to vector<8x32xf32>
    %25 = vector.extract_strided_slice %13 {offsets = [48, 0], sizes = [8, 32], strides = [1, 1]} : vector<64x32xf32> to vector<8x32xf32>
    %26 = vector.extract_strided_slice %13 {offsets = [56, 0], sizes = [8, 32], strides = [1, 1]} : vector<64x32xf32> to vector<8x32xf32>
    %27 = vector.extract_strided_slice %18 {offsets = [0, 0], sizes = [8, 32], strides = [1, 1]} : vector<64x32xf32> to vector<8x32xf32>
    %28 = vector.extract_strided_slice %18 {offsets = [8, 0], sizes = [8, 32], strides = [1, 1]} : vector<64x32xf32> to vector<8x32xf32>
    %29 = vector.extract_strided_slice %18 {offsets = [16, 0], sizes = [8, 32], strides = [1, 1]} : vector<64x32xf32> to vector<8x32xf32>
    %30 = vector.extract_strided_slice %18 {offsets = [24, 0], sizes = [8, 32], strides = [1, 1]} : vector<64x32xf32> to vector<8x32xf32>
    %31 = vector.extract_strided_slice %18 {offsets = [32, 0], sizes = [8, 32], strides = [1, 1]} : vector<64x32xf32> to vector<8x32xf32>
    %32 = vector.extract_strided_slice %18 {offsets = [40, 0], sizes = [8, 32], strides = [1, 1]} : vector<64x32xf32> to vector<8x32xf32>
    %33 = vector.extract_strided_slice %18 {offsets = [48, 0], sizes = [8, 32], strides = [1, 1]} : vector<64x32xf32> to vector<8x32xf32>
    %34 = vector.extract_strided_slice %18 {offsets = [56, 0], sizes = [8, 32], strides = [1, 1]} : vector<64x32xf32> to vector<8x32xf32>
    %c0_15 = arith.constant 0 : index
    %c0_16 = arith.constant 0 : index
    %35 = vector.load %arg4[%c0_15, %c0_16] : memref<32x32xf32, #tpu.memory_space<vmem>>, vector<32x32xf32>
    %c0_17 = arith.constant 0 : index
    %c0_18 = arith.constant 0 : index
    %36 = vector.load %arg5[%c0_17, %c0_18] : memref<32x32xf32, #tpu.memory_space<vmem>>, vector<32x32xf32>
    %c0_19 = arith.constant 0 : index
    %c0_20 = arith.constant 0 : index
    %37 = vector.load %arg8[%c0_19, %c0_20] : memref<32x32xf32, #tpu.memory_space<vmem>>, vector<32x32xf32>
    %c0_21 = arith.constant 0 : index
    %c0_22 = arith.constant 0 : index
    %38 = vector.load %arg9[%c0_21, %c0_22] : memref<32x32xf32, #tpu.memory_space<vmem>>, vector<32x32xf32>
    %c0_23 = arith.constant 0 : index
    %c0_24 = arith.constant 0 : index
    %39 = vector.load %arg10[%c0_23, %c0_24] : memref<32x32xf32, #tpu.memory_space<vmem>>, vector<32x32xf32>
    %c0_25 = arith.constant 0 : index
    %c0_26 = arith.constant 0 : index
    %40 = vector.load %arg11[%c0_25, %c0_26] : memref<32x32xf32, #tpu.memory_space<vmem>>, vector<32x32xf32>
    %c0_27 = arith.constant 0 : index
    %c0_28 = arith.constant 0 : index
    %41 = vector.load %arg14[%c0_27, %c0_28] : memref<1x32xf32, #tpu.memory_space<vmem>>, vector<1x32xf32>
    %c0_29 = arith.constant 0 : index
    %c0_30 = arith.constant 0 : index
    %42 = vector.load %arg15[%c0_29, %c0_30] : memref<1x32xf32, #tpu.memory_space<vmem>>, vector<1x32xf32>
    %43 = math.tanh %19 : vector<8x32xf32>
    %44 = math.tanh %34 : vector<8x32xf32>
    %cst_31 = arith.constant dense<0.000000e+00> : vector<8x32xf32>
    %45 = tpu.matmul %43, %37, %cst_31 {dimension_numbers = #tpu.dot_dimension_numbers<[1], [0], [0], [1], [0, 0, 1, 1], [], []>} : vector<8x32xf32>, vector<32x32xf32>, vector<8x32xf32> -> vector<8x32xf32>
    %cst_32 = arith.constant dense<0.000000e+00> : vector<8x32xf32>
    %46 = tpu.matmul %43, %39, %cst_32 {dimension_numbers = #tpu.dot_dimension_numbers<[1], [0], [0], [1], [0, 0, 1, 1], [], []>} : vector<8x32xf32>, vector<32x32xf32>, vector<8x32xf32> -> vector<8x32xf32>
    %cst_33 = arith.constant dense<0.000000e+00> : vector<8x32xf32>
    %47 = tpu.matmul %44, %38, %cst_33 {dimension_numbers = #tpu.dot_dimension_numbers<[1], [0], [0], [1], [0, 0, 1, 1], [], []>} : vector<8x32xf32>, vector<32x32xf32>, vector<8x32xf32> -> vector<8x32xf32>
    %cst_34 = arith.constant dense<0.000000e+00> : vector<8x32xf32>
    %48 = tpu.matmul %44, %40, %cst_34 {dimension_numbers = #tpu.dot_dimension_numbers<[1], [0], [0], [1], [0, 0, 1, 1], [], []>} : vector<8x32xf32>, vector<32x32xf32>, vector<8x32xf32> -> vector<8x32xf32>
    %cst_35 = arith.constant dense<0.000000e+00> : vector<8x32xf32>
    %49 = tpu.matmul %43, %35, %cst_35 {dimension_numbers = #tpu.dot_dimension_numbers<[1], [0], [0], [1], [0, 0, 1, 1], [], []>} : vector<8x32xf32>, vector<32x32xf32>, vector<8x32xf32> -> vector<8x32xf32>
    %50 = arith.addf %20, %49 : vector<8x32xf32>
    %cst_36 = arith.constant dense<0.000000e+00> : vector<8x32xf32>
    %51 = tpu.matmul %44, %36, %cst_36 {dimension_numbers = #tpu.dot_dimension_numbers<[1], [0], [0], [1], [0, 0, 1, 1], [], []>} : vector<8x32xf32>, vector<32x32xf32>, vector<8x32xf32> -> vector<8x32xf32>
    %52 = arith.addf %33, %51 : vector<8x32xf32>
    %53 = math.tanh %50 : vector<8x32xf32>
    %54 = math.tanh %52 : vector<8x32xf32>
    %cst_37 = arith.constant dense<0.000000e+00> : vector<8x32xf32>
    %55 = tpu.matmul %53, %37, %cst_37 {dimension_numbers = #tpu.dot_dimension_numbers<[1], [0], [0], [1], [0, 0, 1, 1], [], []>} : vector<8x32xf32>, vector<32x32xf32>, vector<8x32xf32> -> vector<8x32xf32>
    %cst_38 = arith.constant dense<0.000000e+00> : vector<8x32xf32>
    %56 = tpu.matmul %53, %39, %cst_38 {dimension_numbers = #tpu.dot_dimension_numbers<[1], [0], [0], [1], [0, 0, 1, 1], [], []>} : vector<8x32xf32>, vector<32x32xf32>, vector<8x32xf32> -> vector<8x32xf32>
    %cst_39 = arith.constant dense<0.000000e+00> : vector<8x32xf32>
    %57 = tpu.matmul %54, %38, %cst_39 {dimension_numbers = #tpu.dot_dimension_numbers<[1], [0], [0], [1], [0, 0, 1, 1], [], []>} : vector<8x32xf32>, vector<32x32xf32>, vector<8x32xf32> -> vector<8x32xf32>
    %cst_40 = arith.constant dense<0.000000e+00> : vector<8x32xf32>
    %58 = tpu.matmul %54, %40, %cst_40 {dimension_numbers = #tpu.dot_dimension_numbers<[1], [0], [0], [1], [0, 0, 1, 1], [], []>} : vector<8x32xf32>, vector<32x32xf32>, vector<8x32xf32> -> vector<8x32xf32>
    %cst_41 = arith.constant dense<0.000000e+00> : vector<8x32xf32>
    %59 = tpu.matmul %53, %35, %cst_41 {dimension_numbers = #tpu.dot_dimension_numbers<[1], [0], [0], [1], [0, 0, 1, 1], [], []>} : vector<8x32xf32>, vector<32x32xf32>, vector<8x32xf32> -> vector<8x32xf32>
    %60 = arith.addf %21, %59 : vector<8x32xf32>
    %cst_42 = arith.constant dense<0.000000e+00> : vector<8x32xf32>
    %61 = tpu.matmul %54, %36, %cst_42 {dimension_numbers = #tpu.dot_dimension_numbers<[1], [0], [0], [1], [0, 0, 1, 1], [], []>} : vector<8x32xf32>, vector<32x32xf32>, vector<8x32xf32> -> vector<8x32xf32>
    %62 = arith.addf %32, %61 : vector<8x32xf32>
    %63 = math.tanh %60 : vector<8x32xf32>
    %64 = math.tanh %62 : vector<8x32xf32>
    %cst_43 = arith.constant dense<0.000000e+00> : vector<8x32xf32>
    %65 = tpu.matmul %63, %37, %cst_43 {dimension_numbers = #tpu.dot_dimension_numbers<[1], [0], [0], [1], [0, 0, 1, 1], [], []>} : vector<8x32xf32>, vector<32x32xf32>, vector<8x32xf32> -> vector<8x32xf32>
    %cst_44 = arith.constant dense<0.000000e+00> : vector<8x32xf32>
    %66 = tpu.matmul %63, %39, %cst_44 {dimension_numbers = #tpu.dot_dimension_numbers<[1], [0], [0], [1], [0, 0, 1, 1], [], []>} : vector<8x32xf32>, vector<32x32xf32>, vector<8x32xf32> -> vector<8x32xf32>
    %cst_45 = arith.constant dense<0.000000e+00> : vector<8x32xf32>
    %67 = tpu.matmul %64, %38, %cst_45 {dimension_numbers = #tpu.dot_dimension_numbers<[1], [0], [0], [1], [0, 0, 1, 1], [], []>} : vector<8x32xf32>, vector<32x32xf32>, vector<8x32xf32> -> vector<8x32xf32>
    %cst_46 = arith.constant dense<0.000000e+00> : vector<8x32xf32>
    %68 = tpu.matmul %64, %40, %cst_46 {dimension_numbers = #tpu.dot_dimension_numbers<[1], [0], [0], [1], [0, 0, 1, 1], [], []>} : vector<8x32xf32>, vector<32x32xf32>, vector<8x32xf32> -> vector<8x32xf32>
    %cst_47 = arith.constant dense<0.000000e+00> : vector<8x32xf32>
    %69 = tpu.matmul %63, %35, %cst_47 {dimension_numbers = #tpu.dot_dimension_numbers<[1], [0], [0], [1], [0, 0, 1, 1], [], []>} : vector<8x32xf32>, vector<32x32xf32>, vector<8x32xf32> -> vector<8x32xf32>
    %70 = arith.addf %22, %69 : vector<8x32xf32>
    %cst_48 = arith.constant dense<0.000000e+00> : vector<8x32xf32>
    %71 = tpu.matmul %64, %36, %cst_48 {dimension_numbers = #tpu.dot_dimension_numbers<[1], [0], [0], [1], [0, 0, 1, 1], [], []>} : vector<8x32xf32>, vector<32x32xf32>, vector<8x32xf32> -> vector<8x32xf32>
    %72 = arith.addf %31, %71 : vector<8x32xf32>
    %73 = math.tanh %70 : vector<8x32xf32>
    %74 = math.tanh %72 : vector<8x32xf32>
    %cst_49 = arith.constant dense<0.000000e+00> : vector<8x32xf32>
    %75 = tpu.matmul %73, %37, %cst_49 {dimension_numbers = #tpu.dot_dimension_numbers<[1], [0], [0], [1], [0, 0, 1, 1], [], []>} : vector<8x32xf32>, vector<32x32xf32>, vector<8x32xf32> -> vector<8x32xf32>
    %cst_50 = arith.constant dense<0.000000e+00> : vector<8x32xf32>
    %76 = tpu.matmul %73, %39, %cst_50 {dimension_numbers = #tpu.dot_dimension_numbers<[1], [0], [0], [1], [0, 0, 1, 1], [], []>} : vector<8x32xf32>, vector<32x32xf32>, vector<8x32xf32> -> vector<8x32xf32>
    %cst_51 = arith.constant dense<0.000000e+00> : vector<8x32xf32>
    %77 = tpu.matmul %74, %38, %cst_51 {dimension_numbers = #tpu.dot_dimension_numbers<[1], [0], [0], [1], [0, 0, 1, 1], [], []>} : vector<8x32xf32>, vector<32x32xf32>, vector<8x32xf32> -> vector<8x32xf32>
    %cst_52 = arith.constant dense<0.000000e+00> : vector<8x32xf32>
    %78 = tpu.matmul %74, %40, %cst_52 {dimension_numbers = #tpu.dot_dimension_numbers<[1], [0], [0], [1], [0, 0, 1, 1], [], []>} : vector<8x32xf32>, vector<32x32xf32>, vector<8x32xf32> -> vector<8x32xf32>
    %cst_53 = arith.constant dense<0.000000e+00> : vector<8x32xf32>
    %79 = tpu.matmul %73, %35, %cst_53 {dimension_numbers = #tpu.dot_dimension_numbers<[1], [0], [0], [1], [0, 0, 1, 1], [], []>} : vector<8x32xf32>, vector<32x32xf32>, vector<8x32xf32> -> vector<8x32xf32>
    %80 = arith.addf %23, %79 : vector<8x32xf32>
    %cst_54 = arith.constant dense<0.000000e+00> : vector<8x32xf32>
    %81 = tpu.matmul %74, %36, %cst_54 {dimension_numbers = #tpu.dot_dimension_numbers<[1], [0], [0], [1], [0, 0, 1, 1], [], []>} : vector<8x32xf32>, vector<32x32xf32>, vector<8x32xf32> -> vector<8x32xf32>
    %82 = arith.addf %30, %81 : vector<8x32xf32>
    %83 = math.tanh %80 : vector<8x32xf32>
    %84 = math.tanh %82 : vector<8x32xf32>
    %cst_55 = arith.constant dense<0.000000e+00> : vector<8x32xf32>
    %85 = tpu.matmul %83, %37, %cst_55 {dimension_numbers = #tpu.dot_dimension_numbers<[1], [0], [0], [1], [0, 0, 1, 1], [], []>} : vector<8x32xf32>, vector<32x32xf32>, vector<8x32xf32> -> vector<8x32xf32>
    %cst_56 = arith.constant dense<0.000000e+00> : vector<8x32xf32>
    %86 = tpu.matmul %83, %39, %cst_56 {dimension_numbers = #tpu.dot_dimension_numbers<[1], [0], [0], [1], [0, 0, 1, 1], [], []>} : vector<8x32xf32>, vector<32x32xf32>, vector<8x32xf32> -> vector<8x32xf32>
    %cst_57 = arith.constant dense<0.000000e+00> : vector<8x32xf32>
    %87 = tpu.matmul %84, %38, %cst_57 {dimension_numbers = #tpu.dot_dimension_numbers<[1], [0], [0], [1], [0, 0, 1, 1], [], []>} : vector<8x32xf32>, vector<32x32xf32>, vector<8x32xf32> -> vector<8x32xf32>
    %cst_58 = arith.constant dense<0.000000e+00> : vector<8x32xf32>
    %88 = tpu.matmul %84, %40, %cst_58 {dimension_numbers = #tpu.dot_dimension_numbers<[1], [0], [0], [1], [0, 0, 1, 1], [], []>} : vector<8x32xf32>, vector<32x32xf32>, vector<8x32xf32> -> vector<8x32xf32>
    %cst_59 = arith.constant dense<0.000000e+00> : vector<8x32xf32>
    %89 = tpu.matmul %83, %35, %cst_59 {dimension_numbers = #tpu.dot_dimension_numbers<[1], [0], [0], [1], [0, 0, 1, 1], [], []>} : vector<8x32xf32>, vector<32x32xf32>, vector<8x32xf32> -> vector<8x32xf32>
    %90 = arith.addf %24, %89 : vector<8x32xf32>
    %cst_60 = arith.constant dense<0.000000e+00> : vector<8x32xf32>
    %91 = tpu.matmul %84, %36, %cst_60 {dimension_numbers = #tpu.dot_dimension_numbers<[1], [0], [0], [1], [0, 0, 1, 1], [], []>} : vector<8x32xf32>, vector<32x32xf32>, vector<8x32xf32> -> vector<8x32xf32>
    %92 = arith.addf %29, %91 : vector<8x32xf32>
    %93 = math.tanh %90 : vector<8x32xf32>
    %94 = math.tanh %92 : vector<8x32xf32>
    %cst_61 = arith.constant dense<0.000000e+00> : vector<8x32xf32>
    %95 = tpu.matmul %93, %37, %cst_61 {dimension_numbers = #tpu.dot_dimension_numbers<[1], [0], [0], [1], [0, 0, 1, 1], [], []>} : vector<8x32xf32>, vector<32x32xf32>, vector<8x32xf32> -> vector<8x32xf32>
    %cst_62 = arith.constant dense<0.000000e+00> : vector<8x32xf32>
    %96 = tpu.matmul %93, %39, %cst_62 {dimension_numbers = #tpu.dot_dimension_numbers<[1], [0], [0], [1], [0, 0, 1, 1], [], []>} : vector<8x32xf32>, vector<32x32xf32>, vector<8x32xf32> -> vector<8x32xf32>
    %cst_63 = arith.constant dense<0.000000e+00> : vector<8x32xf32>
    %97 = tpu.matmul %94, %38, %cst_63 {dimension_numbers = #tpu.dot_dimension_numbers<[1], [0], [0], [1], [0, 0, 1, 1], [], []>} : vector<8x32xf32>, vector<32x32xf32>, vector<8x32xf32> -> vector<8x32xf32>
    %cst_64 = arith.constant dense<0.000000e+00> : vector<8x32xf32>
    %98 = tpu.matmul %94, %40, %cst_64 {dimension_numbers = #tpu.dot_dimension_numbers<[1], [0], [0], [1], [0, 0, 1, 1], [], []>} : vector<8x32xf32>, vector<32x32xf32>, vector<8x32xf32> -> vector<8x32xf32>
    %cst_65 = arith.constant dense<0.000000e+00> : vector<8x32xf32>
    %99 = tpu.matmul %93, %35, %cst_65 {dimension_numbers = #tpu.dot_dimension_numbers<[1], [0], [0], [1], [0, 0, 1, 1], [], []>} : vector<8x32xf32>, vector<32x32xf32>, vector<8x32xf32> -> vector<8x32xf32>
    %100 = arith.addf %25, %99 : vector<8x32xf32>
    %cst_66 = arith.constant dense<0.000000e+00> : vector<8x32xf32>
    %101 = tpu.matmul %94, %36, %cst_66 {dimension_numbers = #tpu.dot_dimension_numbers<[1], [0], [0], [1], [0, 0, 1, 1], [], []>} : vector<8x32xf32>, vector<32x32xf32>, vector<8x32xf32> -> vector<8x32xf32>
    %102 = arith.addf %28, %101 : vector<8x32xf32>
    %103 = math.tanh %100 : vector<8x32xf32>
    %104 = math.tanh %102 : vector<8x32xf32>
    %cst_67 = arith.constant dense<0.000000e+00> : vector<8x32xf32>
    %105 = tpu.matmul %103, %37, %cst_67 {dimension_numbers = #tpu.dot_dimension_numbers<[1], [0], [0], [1], [0, 0, 1, 1], [], []>} : vector<8x32xf32>, vector<32x32xf32>, vector<8x32xf32> -> vector<8x32xf32>
    %cst_68 = arith.constant dense<0.000000e+00> : vector<8x32xf32>
    %106 = tpu.matmul %103, %39, %cst_68 {dimension_numbers = #tpu.dot_dimension_numbers<[1], [0], [0], [1], [0, 0, 1, 1], [], []>} : vector<8x32xf32>, vector<32x32xf32>, vector<8x32xf32> -> vector<8x32xf32>
    %cst_69 = arith.constant dense<0.000000e+00> : vector<8x32xf32>
    %107 = tpu.matmul %104, %38, %cst_69 {dimension_numbers = #tpu.dot_dimension_numbers<[1], [0], [0], [1], [0, 0, 1, 1], [], []>} : vector<8x32xf32>, vector<32x32xf32>, vector<8x32xf32> -> vector<8x32xf32>
    %cst_70 = arith.constant dense<0.000000e+00> : vector<8x32xf32>
    %108 = tpu.matmul %104, %40, %cst_70 {dimension_numbers = #tpu.dot_dimension_numbers<[1], [0], [0], [1], [0, 0, 1, 1], [], []>} : vector<8x32xf32>, vector<32x32xf32>, vector<8x32xf32> -> vector<8x32xf32>
    %cst_71 = arith.constant dense<0.000000e+00> : vector<8x32xf32>
    %109 = tpu.matmul %103, %35, %cst_71 {dimension_numbers = #tpu.dot_dimension_numbers<[1], [0], [0], [1], [0, 0, 1, 1], [], []>} : vector<8x32xf32>, vector<32x32xf32>, vector<8x32xf32> -> vector<8x32xf32>
    %110 = arith.addf %26, %109 : vector<8x32xf32>
    %cst_72 = arith.constant dense<0.000000e+00> : vector<8x32xf32>
    %111 = tpu.matmul %104, %36, %cst_72 {dimension_numbers = #tpu.dot_dimension_numbers<[1], [0], [0], [1], [0, 0, 1, 1], [], []>} : vector<8x32xf32>, vector<32x32xf32>, vector<8x32xf32> -> vector<8x32xf32>
    %112 = arith.addf %27, %111 : vector<8x32xf32>
    %113 = math.tanh %110 : vector<8x32xf32>
    %114 = math.tanh %112 : vector<8x32xf32>
    %cst_73 = arith.constant dense<0.000000e+00> : vector<8x32xf32>
    %115 = tpu.matmul %113, %37, %cst_73 {dimension_numbers = #tpu.dot_dimension_numbers<[1], [0], [0], [1], [0, 0, 1, 1], [], []>} : vector<8x32xf32>, vector<32x32xf32>, vector<8x32xf32> -> vector<8x32xf32>
    %cst_74 = arith.constant dense<0.000000e+00> : vector<8x32xf32>
    %116 = tpu.matmul %113, %39, %cst_74 {dimension_numbers = #tpu.dot_dimension_numbers<[1], [0], [0], [1], [0, 0, 1, 1], [], []>} : vector<8x32xf32>, vector<32x32xf32>, vector<8x32xf32> -> vector<8x32xf32>
    %cst_75 = arith.constant dense<0.000000e+00> : vector<8x32xf32>
    %117 = tpu.matmul %114, %38, %cst_75 {dimension_numbers = #tpu.dot_dimension_numbers<[1], [0], [0], [1], [0, 0, 1, 1], [], []>} : vector<8x32xf32>, vector<32x32xf32>, vector<8x32xf32> -> vector<8x32xf32>
    %cst_76 = arith.constant dense<0.000000e+00> : vector<8x32xf32>
    %118 = tpu.matmul %114, %40, %cst_76 {dimension_numbers = #tpu.dot_dimension_numbers<[1], [0], [0], [1], [0, 0, 1, 1], [], []>} : vector<8x32xf32>, vector<32x32xf32>, vector<8x32xf32> -> vector<8x32xf32>
    %119 = arith.addf %45, %117 : vector<8x32xf32>
    %120 = vector.broadcast %41 : vector<1x32xf32> to vector<8x32xf32>
    %121 = arith.addf %119, %120 : vector<8x32xf32>
    %122 = arith.addf %55, %107 : vector<8x32xf32>
    %123 = vector.broadcast %41 : vector<1x32xf32> to vector<8x32xf32>
    %124 = arith.addf %122, %123 : vector<8x32xf32>
    %125 = arith.addf %65, %97 : vector<8x32xf32>
    %126 = vector.broadcast %41 : vector<1x32xf32> to vector<8x32xf32>
    %127 = arith.addf %125, %126 : vector<8x32xf32>
    %128 = arith.addf %75, %87 : vector<8x32xf32>
    %129 = vector.broadcast %41 : vector<1x32xf32> to vector<8x32xf32>
    %130 = arith.addf %128, %129 : vector<8x32xf32>
    %131 = arith.addf %85, %77 : vector<8x32xf32>
    %132 = vector.broadcast %41 : vector<1x32xf32> to vector<8x32xf32>
    %133 = arith.addf %131, %132 : vector<8x32xf32>
    %134 = arith.addf %95, %67 : vector<8x32xf32>
    %135 = vector.broadcast %41 : vector<1x32xf32> to vector<8x32xf32>
    %136 = arith.addf %134, %135 : vector<8x32xf32>
    %137 = arith.addf %105, %57 : vector<8x32xf32>
    %138 = vector.broadcast %41 : vector<1x32xf32> to vector<8x32xf32>
    %139 = arith.addf %137, %138 : vector<8x32xf32>
    %140 = arith.addf %115, %47 : vector<8x32xf32>
    %141 = vector.broadcast %41 : vector<1x32xf32> to vector<8x32xf32>
    %142 = arith.addf %140, %141 : vector<8x32xf32>
    %143 = arith.addf %46, %118 : vector<8x32xf32>
    %144 = vector.broadcast %42 : vector<1x32xf32> to vector<8x32xf32>
    %145 = arith.addf %143, %144 : vector<8x32xf32>
    %146 = arith.addf %56, %108 : vector<8x32xf32>
    %147 = vector.broadcast %42 : vector<1x32xf32> to vector<8x32xf32>
    %148 = arith.addf %146, %147 : vector<8x32xf32>
    %149 = arith.addf %66, %98 : vector<8x32xf32>
    %150 = vector.broadcast %42 : vector<1x32xf32> to vector<8x32xf32>
    %151 = arith.addf %149, %150 : vector<8x32xf32>
    %152 = arith.addf %76, %88 : vector<8x32xf32>
    %153 = vector.broadcast %42 : vector<1x32xf32> to vector<8x32xf32>
    %154 = arith.addf %152, %153 : vector<8x32xf32>
    %155 = arith.addf %86, %78 : vector<8x32xf32>
    %156 = vector.broadcast %42 : vector<1x32xf32> to vector<8x32xf32>
    %157 = arith.addf %155, %156 : vector<8x32xf32>
    %158 = arith.addf %96, %68 : vector<8x32xf32>
    %159 = vector.broadcast %42 : vector<1x32xf32> to vector<8x32xf32>
    %160 = arith.addf %158, %159 : vector<8x32xf32>
    %161 = arith.addf %106, %58 : vector<8x32xf32>
    %162 = vector.broadcast %42 : vector<1x32xf32> to vector<8x32xf32>
    %163 = arith.addf %161, %162 : vector<8x32xf32>
    %164 = arith.addf %116, %48 : vector<8x32xf32>
    %165 = vector.broadcast %42 : vector<1x32xf32> to vector<8x32xf32>
    %166 = arith.addf %164, %165 : vector<8x32xf32>
    %c0_77 = arith.constant 0 : index
    %c0_78 = arith.constant 0 : index
    %167 = vector.load %arg12[%c0_77, %c0_78] : memref<32x32xf32, #tpu.memory_space<vmem>>, vector<32x32xf32>
    %c0_79 = arith.constant 0 : index
    %c0_80 = arith.constant 0 : index
    %168 = vector.load %arg13[%c0_79, %c0_80] : memref<32x32xf32, #tpu.memory_space<vmem>>, vector<32x32xf32>
    %169 = math.tanh %121 : vector<8x32xf32>
    %170 = math.tanh %166 : vector<8x32xf32>
    %cst_81 = arith.constant dense<0.000000e+00> : vector<8x32xf32>
    %171 = tpu.matmul %169, %167, %cst_81 {dimension_numbers = #tpu.dot_dimension_numbers<[1], [0], [0], [1], [0, 0, 1, 1], [], []>} : vector<8x32xf32>, vector<32x32xf32>, vector<8x32xf32> -> vector<8x32xf32>
    %172 = arith.addf %124, %171 : vector<8x32xf32>
    %cst_82 = arith.constant dense<0.000000e+00> : vector<8x32xf32>
    %173 = tpu.matmul %170, %168, %cst_82 {dimension_numbers = #tpu.dot_dimension_numbers<[1], [0], [0], [1], [0, 0, 1, 1], [], []>} : vector<8x32xf32>, vector<32x32xf32>, vector<8x32xf32> -> vector<8x32xf32>
    %174 = arith.addf %163, %173 : vector<8x32xf32>
    %175 = math.tanh %172 : vector<8x32xf32>
    %176 = math.tanh %174 : vector<8x32xf32>
    %cst_83 = arith.constant dense<0.000000e+00> : vector<8x32xf32>
    %177 = tpu.matmul %175, %167, %cst_83 {dimension_numbers = #tpu.dot_dimension_numbers<[1], [0], [0], [1], [0, 0, 1, 1], [], []>} : vector<8x32xf32>, vector<32x32xf32>, vector<8x32xf32> -> vector<8x32xf32>
    %178 = arith.addf %127, %177 : vector<8x32xf32>
    %cst_84 = arith.constant dense<0.000000e+00> : vector<8x32xf32>
    %179 = tpu.matmul %176, %168, %cst_84 {dimension_numbers = #tpu.dot_dimension_numbers<[1], [0], [0], [1], [0, 0, 1, 1], [], []>} : vector<8x32xf32>, vector<32x32xf32>, vector<8x32xf32> -> vector<8x32xf32>
    %180 = arith.addf %160, %179 : vector<8x32xf32>
    %181 = math.tanh %178 : vector<8x32xf32>
    %182 = math.tanh %180 : vector<8x32xf32>
    %cst_85 = arith.constant dense<0.000000e+00> : vector<8x32xf32>
    %183 = tpu.matmul %181, %167, %cst_85 {dimension_numbers = #tpu.dot_dimension_numbers<[1], [0], [0], [1], [0, 0, 1, 1], [], []>} : vector<8x32xf32>, vector<32x32xf32>, vector<8x32xf32> -> vector<8x32xf32>
    %184 = arith.addf %130, %183 : vector<8x32xf32>
    %cst_86 = arith.constant dense<0.000000e+00> : vector<8x32xf32>
    %185 = tpu.matmul %182, %168, %cst_86 {dimension_numbers = #tpu.dot_dimension_numbers<[1], [0], [0], [1], [0, 0, 1, 1], [], []>} : vector<8x32xf32>, vector<32x32xf32>, vector<8x32xf32> -> vector<8x32xf32>
    %186 = arith.addf %157, %185 : vector<8x32xf32>
    %187 = math.tanh %184 : vector<8x32xf32>
    %188 = math.tanh %186 : vector<8x32xf32>
    %cst_87 = arith.constant dense<0.000000e+00> : vector<8x32xf32>
    %189 = tpu.matmul %187, %167, %cst_87 {dimension_numbers = #tpu.dot_dimension_numbers<[1], [0], [0], [1], [0, 0, 1, 1], [], []>} : vector<8x32xf32>, vector<32x32xf32>, vector<8x32xf32> -> vector<8x32xf32>
    %190 = arith.addf %133, %189 : vector<8x32xf32>
    %cst_88 = arith.constant dense<0.000000e+00> : vector<8x32xf32>
    %191 = tpu.matmul %188, %168, %cst_88 {dimension_numbers = #tpu.dot_dimension_numbers<[1], [0], [0], [1], [0, 0, 1, 1], [], []>} : vector<8x32xf32>, vector<32x32xf32>, vector<8x32xf32> -> vector<8x32xf32>
    %192 = arith.addf %154, %191 : vector<8x32xf32>
    %193 = math.tanh %190 : vector<8x32xf32>
    %194 = math.tanh %192 : vector<8x32xf32>
    %cst_89 = arith.constant dense<0.000000e+00> : vector<8x32xf32>
    %195 = tpu.matmul %193, %167, %cst_89 {dimension_numbers = #tpu.dot_dimension_numbers<[1], [0], [0], [1], [0, 0, 1, 1], [], []>} : vector<8x32xf32>, vector<32x32xf32>, vector<8x32xf32> -> vector<8x32xf32>
    %196 = arith.addf %136, %195 : vector<8x32xf32>
    %cst_90 = arith.constant dense<0.000000e+00> : vector<8x32xf32>
    %197 = tpu.matmul %194, %168, %cst_90 {dimension_numbers = #tpu.dot_dimension_numbers<[1], [0], [0], [1], [0, 0, 1, 1], [], []>} : vector<8x32xf32>, vector<32x32xf32>, vector<8x32xf32> -> vector<8x32xf32>
    %198 = arith.addf %151, %197 : vector<8x32xf32>
    %199 = math.tanh %196 : vector<8x32xf32>
    %200 = math.tanh %198 : vector<8x32xf32>
    %cst_91 = arith.constant dense<0.000000e+00> : vector<8x32xf32>
    %201 = tpu.matmul %199, %167, %cst_91 {dimension_numbers = #tpu.dot_dimension_numbers<[1], [0], [0], [1], [0, 0, 1, 1], [], []>} : vector<8x32xf32>, vector<32x32xf32>, vector<8x32xf32> -> vector<8x32xf32>
    %202 = arith.addf %139, %201 : vector<8x32xf32>
    %cst_92 = arith.constant dense<0.000000e+00> : vector<8x32xf32>
    %203 = tpu.matmul %200, %168, %cst_92 {dimension_numbers = #tpu.dot_dimension_numbers<[1], [0], [0], [1], [0, 0, 1, 1], [], []>} : vector<8x32xf32>, vector<32x32xf32>, vector<8x32xf32> -> vector<8x32xf32>
    %204 = arith.addf %148, %203 : vector<8x32xf32>
    %205 = math.tanh %202 : vector<8x32xf32>
    %206 = math.tanh %204 : vector<8x32xf32>
    %cst_93 = arith.constant dense<0.000000e+00> : vector<8x32xf32>
    %207 = tpu.matmul %205, %167, %cst_93 {dimension_numbers = #tpu.dot_dimension_numbers<[1], [0], [0], [1], [0, 0, 1, 1], [], []>} : vector<8x32xf32>, vector<32x32xf32>, vector<8x32xf32> -> vector<8x32xf32>
    %208 = arith.addf %142, %207 : vector<8x32xf32>
    %cst_94 = arith.constant dense<0.000000e+00> : vector<8x32xf32>
    %209 = tpu.matmul %206, %168, %cst_94 {dimension_numbers = #tpu.dot_dimension_numbers<[1], [0], [0], [1], [0, 0, 1, 1], [], []>} : vector<8x32xf32>, vector<32x32xf32>, vector<8x32xf32> -> vector<8x32xf32>
    %210 = arith.addf %145, %209 : vector<8x32xf32>
    %211 = math.tanh %208 : vector<8x32xf32>
    %212 = math.tanh %210 : vector<8x32xf32>
    %c0_95 = arith.constant 0 : index
    %c0_96 = arith.constant 0 : index
    %213 = vector.load %arg16[%c0_95, %c0_96] : memref<32x4xf32, #tpu.memory_space<vmem>>, vector<32x4xf32>
    %cst_97 = arith.constant dense<0.000000e+00> : vector<8x4xf32>
    %214 = tpu.matmul %211, %213, %cst_97 {dimension_numbers = #tpu.dot_dimension_numbers<[1], [0], [0], [1], [0, 0, 1, 1], [], []>} : vector<8x32xf32>, vector<32x4xf32>, vector<8x4xf32> -> vector<8x4xf32>
    %c0_98 = arith.constant 0 : index
    %c0_99 = arith.constant 0 : index
    %215 = vector.load %arg17[%c0_98, %c0_99] : memref<32x4xf32, #tpu.memory_space<vmem>>, vector<32x4xf32>
    %cst_100 = arith.constant dense<0.000000e+00> : vector<8x4xf32>
    %216 = tpu.matmul %212, %215, %cst_100 {dimension_numbers = #tpu.dot_dimension_numbers<[1], [0], [0], [1], [0, 0, 1, 1], [], []>} : vector<8x32xf32>, vector<32x4xf32>, vector<8x4xf32> -> vector<8x4xf32>
    %217 = arith.addf %214, %216 : vector<8x4xf32>
    %c0_101 = arith.constant 0 : index
    %c0_102 = arith.constant 0 : index
    %218 = vector.load %arg18[%c0_101, %c0_102] : memref<1x4xf32, #tpu.memory_space<vmem>>, vector<1x4xf32>
    %219 = vector.broadcast %218 : vector<1x4xf32> to vector<8x4xf32>
    %220 = arith.addf %217, %219 : vector<8x4xf32>
    %c0_103 = arith.constant 0 : index
    %c0_104 = arith.constant 0 : index
    %221 = vector.load %arg19[%c0_103, %c0_104] : memref<8x4xf32, #tpu.memory_space<vmem>>, vector<8x4xf32>
    tpu.vector_store %arg19[%c0_103, %c0_104], %220 {strides = array<i32>} : memref<8x4xf32, #tpu.memory_space<vmem>>, vector<8x4xf32>,
    return
  }
}

</mosaic_0001>

<bundles_post_ra>
// kernel: rnn_forward.1
= control target key start
LH: loop header
LB: loop body
LE: loop exit
PB: predicated region body
PF: predicated region fallthrough
CT: control target
= control target key end

     0   :  { %s7862_s0 = inlined_call_operand.vmem [shape: s32[64,1], index: 0, kind: input, shape index: {}]   ;;  %s7863_s1 = inlined_call_operand.vmem [shape: f32[50,32], index: 1, kind: input, shape index: {}]   ;;  %s7864_s2 = inlined_call_operand.vmem [shape: f32[32,32], index: 2, kind: input, shape index: {}]   ;;  %s7865_s3 = inlined_call_operand.vmem [shape: f32[32,32], index: 3, kind: input, shape index: {}]   ;;  %s7866_s4 = inlined_call_operand.vmem [shape: f32[32,32], index: 4, kind: input, shape index: {}]   ;;  %s7867_s5 = inlined_call_operand.vmem [shape: f32[32,32], index: 5, kind: input, shape index: {}]   ;;  %s7868_s6 = inlined_call_operand.hbm [shape: f32[1,32], index: 6, kind: input, shape index: {}]   ;;  %s7869_s7 = inlined_call_operand.hbm [shape: f32[1,32], index: 7, kind: input, shape index: {}]   ;;  %s7870_s8 = inlined_call_operand.vmem [shape: f32[32,32], index: 8, kind: input, shape index: {}]   ;;  %s7871_s9 = inlined_call_operand.vmem [shape: f32[32,32], index: 9, kind: input, shape index: {}]   ;;  %s7872_s10 = inlined_call_operand.vmem [shape: f32[32,32], index: 10, kind: input, shape index: {}]   ;;  %s7873_s11 = inlined_call_operand.vmem [shape: f32[32,32], index: 11, kind: input, shape index: {}]   ;;  %s7874_s12 = inlined_call_operand.vmem [shape: f32[32,32], index: 12, kind: input, shape index: {}]   ;;  %s7875_s13 = inlined_call_operand.hbm [shape: f32[32,32], index: 13, kind: input, shape index: {}]   ;;  %s7876_s14 = inlined_call_operand.vmem [shape: f32[1,32], index: 14, kind: input, shape index: {}]   ;;  %s7877_s15 = inlined_call_operand.vmem [shape: f32[1,32], index: 15, kind: input, shape index: {}]   ;;  %s7878_s16 = inlined_call_operand.vmem [shape: f32[32,4], index: 16, kind: input, shape index: {}]   ;;  %s7879_s17 = inlined_call_operand.vmem [shape: f32[32,4], index: 17, kind: input, shape index: {}]   ;;  %s7880_s18 = inlined_call_operand.vmem [shape: f32[1,4], index: 18, kind: input, shape index: {}]   ;;  %s7881_s19 = inlined_call_operand.vmem [shape: f32[8,4], index: 19, kind: output, shape index: {}]  }
   0x1   :  { %7886 = sst [smem:[#allocation9_spill]] %s7862_s0 }
   0x2   :  { %7887 = sst [smem:[#allocation10_spill]] %s7863_s1 }
   0x3   :  { %7888 = sst [smem:[#allocation11_spill]] %s7864_s2 }
   0x4   :  { %7889 = sst [smem:[#allocation12_spill]] %s7865_s3 }
   0x5   :  { %24 = vsyncpa [#allocation3], 0 }
   0x6   :  { %25 = vsyncpa [#allocation5], 0  ;;  %s6933_s0 = smov [#allocation4]   ;;  %s6934_s20 = smov [#allocation2]  }
   0x7   :  { %s54_s30 = sshll.u32 %s6933_s0, 4  ;;  %s44_s21 = sshll.u32 %s6934_s20, 4  ;;  %s55_s30 = int_to_ptr.vmem [resolvable:$true] %s54_s30  ;;  %s45_s21 = int_to_ptr.vmem [resolvable:$true] %s44_s21 }
   0x8   :  { %s6863_s2 = scalar_lea.hbm %s7869_s7, 16 }
   0x9   :  { %p6864_p0 = scmp.ne.s32.totalorder %s7869_s7, %s6863_s2  ;;  %p6867_p1 = scmp.lt.u32.totalorder %s6863_s2, %s7869_s7 }
   0xb   :  { %p6869_p2 = pnand %p6867_p1, %p6864_p0 }
   0xd   :  { %6872 = shalt.err (!%p6869_p2)
}
   0xe   :  { %s6873_s26 = scalar_lea.vmem %s55_s30, 16  ;;  %s6877_s27 = scalar_lea.vmem %s55_s30, 32 }
   0xf   :  { %p6874_p3 = scmp.ne.s32.totalorder %s55_s30, %s6873_s26  ;;  %p6878_p4 = scmp.lt.s32.totalorder %s55_s30, %s55_s30 }
  0x10   :  { %p6879_p5 = scmp.lt.s32.totalorder %s6877_s27, %s6873_s26 }
  0x12   :  { %p6880_p6 = por %p6879_p5, %p6878_p4 }
  0x14   :  { %p6881_p7 = pnand %p6880_p6, %p6874_p3 }
  0x16   :  { %6884 = shalt.err (!%p6881_p7)
}
  0x17   :  { %57 = dma.hbm_to_vmem [thread:$0]  %s7869_s7, 16, %s55_s30, [#allocation5]  }
  0x18   :  { %s6885_s1 = scalar_lea.hbm %s7868_s6, 16 }
  0x19   :  { %p6886_p8 = scmp.ne.s32.totalorder %s7868_s6, %s6885_s1  ;;  %p6889_p9 = scmp.lt.u32.totalorder %s6885_s1, %s7868_s6 }
  0x1b   :  { %p6891_p10 = pnand %p6889_p9, %p6886_p8 }
  0x1d   :  { %6894 = shalt.err (!%p6891_p10)
}
  0x1e   :  { %s6895_s25 = scalar_lea.vmem %s45_s21, 16  ;;  %s6899_s3 = scalar_lea.vmem %s45_s21, 32 }
  0x1f   :  { %p6896_p11 = scmp.ne.s32.totalorder %s45_s21, %s6895_s25  ;;  %p6900_p12 = scmp.lt.s32.totalorder %s45_s21, %s45_s21 }
  0x20   :  { %p6901_p13 = scmp.lt.s32.totalorder %s6899_s3, %s6895_s25 }
  0x22   :  { %p6902_p0 = por %p6901_p13, %p6900_p12 }
  0x24   :  { %p6903_p1 = pnand %p6902_p0, %p6896_p11 }
  0x26   :  { %6906 = shalt.err (!%p6903_p1)
}
  0x27   :  { %47 = dma.hbm_to_vmem [thread:$0]  %s7868_s6, 16, %s45_s21, [#allocation3]  }
  0x28   :  { %s6935_s26 = smov [#allocation6]   ;;  %s6907_s0 = scalar_lea.hbm %s7875_s13, 512 }
  0x29   :  { %s73_s27 = sshll.u32 %s6935_s26, 4  ;;  %p6908_p2 = scmp.ne.s32.totalorder %s7875_s13, %s6907_s0  ;;  %s74_s27 = int_to_ptr.vmem [resolvable:$true] %s73_s27 }
  0x2a   :  { %p6911_p3 = scmp.lt.u32.totalorder %s6907_s0, %s7875_s13 }
  0x2c   :  { %p6913_p4 = pnand %p6911_p3, %p6908_p2 }
  0x2e   :  { %6916 = shalt.err (!%p6913_p4)
}
  0x2f   :  { %s6917_s23 = scalar_lea.vmem %s74_s27, 512  ;;  %p6922_p6 = scmp.lt.s32.totalorder %s74_s27, %s74_s27 }
  0x30   :  { %p6918_p5 = scmp.ne.s32.totalorder %s74_s27, %s6917_s23  ;;  %p6923_p7 = scmp.lt.s32.totalorder %s6917_s23, %s6917_s23 }
  0x32   :  { %p6924_p8 = por %p6923_p7, %p6922_p6 }
  0x34   :  { %p6925_p9 = pnand %p6924_p8, %p6918_p5 }
  0x36   :  { %6928 = shalt.err (!%p6925_p9)
}
  0x37   :  { %s6936_s6 = smov 128   ;;  %s6937_s21 = smov 8  }
  0x38   :  { %79 = dma.hbm_to_vmem [thread:$0]  %s7875_s13, 512, %s74_s27, [#allocation5], %s6936_s6, %s6936_s6, %s6937_s21  }
  0x39   :  { %6929 = dma.done.wait [#allocation3], 16  }
  0x3a   :  { %6930 = vsyncadd [#allocation3], 4294967280 }
  0x3b   :  { %6931 = dma.done.wait [#allocation5], 528  }
  0x3c   :  { %6932 = vsyncadd [#allocation5], 4294966768  ;;  %v6938_v0 = vmov 0   ;;  %s7890_s30 = sld [smem:[#allocation9_spill]]  ;;  %s7891_s22 = sld [smem:[#allocation10_spill]]  ;;  %vm181_vm0 = vcmask 1041408   ;;  %v107_v25 = vlaneseq }
  0x3d   :  { %6798 = vset.pattern.permute.xlu1 %v6938_v0  ;;  %6797 = vset.pattern.permute.xlu0 %v6938_v0  ;;  %s7892_s3 = sld [smem:[#allocation11_spill]]  ;;  %vm156_vm1 = vcmask 408576   ;;  %v6939_v29 = vmov 0.0   ;;  %s7893_s27 = sld [smem:[#allocation12_spill]]  ;;  %vm301_vm10 = vcmask 261120   ;;  %v547_v58 = vld [vmem:[%s7866_s4] sm:$0xff] }
  0x3e   :  { %v108_v26 = vand.u32 127, %v107_v25  ;;  %v548_v59 = vld [vmem:[%s7866_s4 + $0x8] sm:$0xff]  ;;  %v6940_v61 = vmov 0.0|0.0   ;;  %v549_v62 = vld [vmem:[%s7866_s4 + $0x10] sm:$0xff]  ;;  %v550_v63 = vld [vmem:[%s7866_s4 + $0x18] sm:$0xff]  ;;  %vm6941_vm11 = vmmov 0  }
  0x3f   :  { %v7185_v60 = vpack.c.bf16 %v548_v59, %v547_v58  ;;  %v7197_v0 = vpack.c.bf16 %v550_v63, %v549_v62  ;;  %v5147_v25 = vld [vmem:[#allocation4] ss:$0 sm:$0xff]  ;;  %vm5121_vm12 = vcmask 31744  }
  0x42   :  { %v101_v1 = vld [vmem:[%s7890_s30 + $0x10] sm:$0xff]  ;;  %v99_v2 = vld [vmem:[%s7890_s30] sm:$0xff]  ;;  %v102_v3 = vld [vmem:[%s7890_s30 + $0x18] sm:$0xff] }
  0x43   :  { %116 = vperm.xlu1 %6798, %v101_v1   ;;  %110 = vperm.xlu0 %6797, %v99_v2   ;;  %v100_v4 = vld [vmem:[%s7890_s30 + $0x8] sm:$0xff]  ;;  %v149_v5 = vld [vmem:[%s7891_s22] sm:$0xff]  ;;  %v151_v7 = vld [vmem:[%s7891_s22 + $0x10] sm:$0xff] }
  0x44   :  { %v150_v6 = vld [vmem:[%s7891_s22 + $0x8] sm:$0xff]  ;;  %v152_v8 = vld [vmem:[%s7891_s22 + $0x18] sm:$0xff]  ;;  %v153_v11 = vld [vmem:[%s7891_s22 + $0x20] sm:$0xff] }
  0x45   :  { %v6318_v9 = vpack.c.bf16 %v150_v6, %v149_v5  ;;  %v6322_v10 = vpack.c.bf16 %v152_v8, %v151_v7  ;;  %v154_v12 = vld [vmem:[%s7891_s22 + $0x28] sm:$0xff]  ;;  %v103_v14 = vld [vmem:[%s7890_s30 + $0x20] sm:$0xff]  ;;  %v106_v16 = vld [vmem:[%s7890_s30 + $0x38] sm:$0xff] }
  0x46   :  { %v104_v13 = vld [vmem:[%s7890_s30 + $0x28] sm:$0xff]  ;;  %v6326_v15 = vpack.c.bf16 %v154_v12, %v153_v11  ;;  %v105_v17 = vld [vmem:[%s7890_s30 + $0x30] sm:$0xff]  ;;  %v290_v19 = vld [vmem:[%s7892_s3] sm:$0xff] }
  0x47   :  { %119 = vperm.xlu1 %6798, %v102_v3   ;;  %113 = vperm.xlu0 %6797, %v100_v4   ;;  %v155_v18 = vld [vmem:[%s7891_s22 + $0x30] sm:$0x3]  ;;  %v291_v20 = vld [vmem:[%s7892_s3 + $0x8] sm:$0xff]  ;;  %v293_v23 = vld [vmem:[%s7892_s3 + $0x18] sm:$0xff] }
  0x48   :  { %6319 = vmatprep.subr.bf16.mxu0 %v6318_v9  ;;  %v292_v21 = vld [vmem:[%s7892_s3 + $0x10] sm:$0xff]  ;;  %v6330_v22 = vpack.c.bf16 %v291_v20, %v290_v19  ;;  %v431_v44 = vld [vmem:[%s7893_s27] sm:$0xff]  ;;  %v432_v45 = vld [vmem:[%s7893_s27 + $0x8] sm:$0xff] }
  0x49   :  { %6321 = vmatpush3.bf16.msra.mxu0 %v6318_v9  ;;  %v6334_v24 = vpack.c.bf16 %v293_v23, %v292_v21  ;;  %v6338_v46 = vpack.c.bf16 %v432_v45, %v431_v44  ;;  %v433_v47 = vld [vmem:[%s7893_s27 + $0x10] sm:$0xff]  ;;  %v434_v48 = vld [vmem:[%s7893_s27 + $0x18] sm:$0xff]  ;;  %v559_v1 = vld [vmem:[%s7871_s9] sm:$0xff] }
  0x4a   :  { %6323 = vmatprep.subr.bf16.mxu0 %v6322_v10  ;;  %6331 = vmatprep.subr.bf16.mxu1 %v6330_v22  ;;  %v6342_v51 = vpack.c.bf16 %v434_v48, %v433_v47  ;;  %v560_v2 = vld [vmem:[%s7871_s9 + $0x8] sm:$0xff]  ;;  %v561_v4 = vld [vmem:[%s7871_s9 + $0x10] sm:$0xff]  ;;  %v562_v5 = vld [vmem:[%s7871_s9 + $0x18] sm:$0xff] }
  0x4b   :  { %125 = vperm.xlu1 %6798, %v104_v13   ;;  %122 = vperm.xlu0 %6797, %v103_v14   ;;  %v7211_v3 = vpack.c.bf16 %v560_v2, %v559_v1  ;;  %v7221_v6 = vpack.c.bf16 %v562_v5, %v561_v4  ;;  %v5138_v7 = vld [vmem:[#allocation2] ss:$0 sm:$0xff]  ;;  %v568_v44 = vld [vmem:[%s7873_s11 + $0x8] sm:$0xff]  ;;  %v570_v47 = vld [vmem:[%s7873_s11 + $0x18] sm:$0xff] }
  0x4c   :  { %6333 = vmatpush3.bf16.msra.mxu1 %v6330_v22 }
  0x4d   :  { %6325 = vmatpush3.bf16.msra.mxu0 %v6322_v10  ;;  %6335 = vmatprep.subr.bf16.mxu1 %v6334_v24 }
  0x4e   :  { %6327 = vmatprep.subr.bf16.mxu0 %v6326_v15 }
  0x4f   :  { %131 = vperm.xlu1 %6798, %v106_v16   ;;  %128 = vperm.xlu0 %6797, %v105_v17  }
  0x50   :  { %6337 = vmatpush3.bf16.msra.mxu1 %v6334_v24 }
  0x51   :  { %6329 = vmatpush3.bf16.msra.mxu0 %v6326_v15  ;;  %6339 = vmatprep.subr.bf16.mxu1 %v6338_v46 }
  0x52   :  { %5582 = vmatprep.subr.msk.mxu0 %vm181_vm0, %v155_v18 }
  0x55   :  { %5583 = vmatpush3.msk.msra.mxu0 %vm181_vm0, %v155_v18 }
  0x56   :  { %6346 = vmatprep.subr.bf16.mxu0 %v6940_v61 }
  0xc2   :  { %v117_v27 = vpop.permute.xlu1 %116  ;;  %v111_v28 = vpop.permute.xlu0 %110 }
  0xc3   :  { %vm133_vm2 = vcmp.eq.s32.totalorder %v108_v26, %v111_v28  ;;  %vm135_vm3 = vcmp.eq.s32.totalorder %v108_v26, %v117_v27 }
  0xc4   :  { %v141_v30 = vsel %vm133_vm2, 1.0, %v6939_v29  ;;  %v143_v33 = vsel %vm135_vm3, 1.0, %v6939_v29 }
  0xc5   :  { %5584 = vmatprep.mubr.msk.f32.mxu0 %vm156_vm1, %v141_v30 }
  0xc6   :  { %v120_v31 = vpop.permute.xlu1 %119  ;;  %v114_v32 = vpop.permute.xlu0 %113 }
  0xc7   :  { %vm134_vm4 = vcmp.eq.s32.totalorder %v108_v26, %v114_v32  ;;  %vm136_vm5 = vcmp.eq.s32.totalorder %v108_v26, %v120_v31 }
  0xc8   :  { %v142_v34 = vsel %vm134_vm4, 1.0, %v6939_v29  ;;  %v144_v37 = vsel %vm136_vm5, 1.0, %v6939_v29 }
  0xc9   :  { %5585 = vmatmul.mubr.msk.f32.vlgmr.msra.gmra.mrb[0].mxu0 %vm156_vm1, %v142_v34 }
  0xca   :  { %v126_v35 = vpop.permute.xlu1 %125  ;;  %5587 = vmatprep.mubr.msk.f32.mxu0 %vm156_vm1, %v143_v33  ;;  %v123_v36 = vpop.permute.xlu0 %122  ;;  %6348 = vmatpush3.bf16.msra.mxu0 %v7211_v3 }
  0xcb   :  { %vm137_vm6 = vcmp.eq.s32.totalorder %v108_v26, %v123_v36  ;;  %vm138_vm7 = vcmp.eq.s32.totalorder %v108_v26, %v126_v35  ;;  %6349 = vmatprep.subr.bf16.mxu0 %v6940_v61 }
  0xcc   :  { %v145_v38 = vsel %vm137_vm6, 1.0, %v6939_v29  ;;  %v146_v41 = vsel %vm138_vm7, 1.0, %v6939_v29 }
  0xcd   :  { %5588 = vmatmul.mubr.msk.f32.gmra.mrb[2].mxu0 %vm156_vm1, %v144_v37 }
  0xce   :  { %v132_v39 = vpop.permute.xlu1 %131  ;;  %5590 = vmatprep.mubr.msk.f32.mxu0 %vm156_vm1, %v145_v38  ;;  %v129_v40 = vpop.permute.xlu0 %128  ;;  %6351 = vmatpush3.bf16.msra.mxu0 %v7221_v6 }
  0xcf   :  { %vm139_vm8 = vcmp.eq.s32.totalorder %v108_v26, %v129_v40  ;;  %vm140_vm9 = vcmp.eq.s32.totalorder %v108_v26, %v132_v39  ;;  %6352 = vmatprep.subr.bf16.mxu0 %v6940_v61 }
  0xd0   :  { %v147_v42 = vsel %vm139_vm8, 1.0, %v6939_v29  ;;  %v148_v43 = vsel %vm140_vm9, 1.0, %v6939_v29 }
  0xd1   :  { %5591 = vmatmul.mubr.msk.f32.gmra.mrb[4].mxu0 %vm156_vm1, %v146_v41 }
  0xd2   :  { %5593 = vmatprep.mubr.msk.f32.mxu0 %vm156_vm1, %v147_v42 }
  0xd5   :  { %5594 = vmatmul.mubr.msk.f32.gmra.mrb[6].mxu0 %vm156_vm1, %v148_v43  ;;  %v567_v43 = vld [vmem:[%s7873_s11] sm:$0xff] }
  0xd6   :  { %5644 = vmatprep.mubr.msk.f32.mxu0 %vm6941_vm11, %v6939_v29  ;;  %v7267_v45 = vpack.c.bf16 %v568_v44, %v567_v43 }
 0x19c   :  { %v5586_v49 = vpop.f32.mrb[0].mxu0 }
 0x19d   :  { %v251_v50 = vpop.f32.mrb[1].mxu0 }
 0x19e   :  { %5604 = vmatprep.mubr.msk.f32.mxu1 %vm301_vm10, %v251_v50 }
 0x19f   :  { %5605 = vmatmul.mubr.msk.f32.vlgmr.msra.gmra.mrb[0].mxu1 %vm301_vm10, %v5586_v49 }
 0x1a0   :  { %6341 = vmatpush3.bf16.msra.mxu1 %v6338_v46  ;;  %v5589_v52 = vpop.f32.mrb[2].mxu0  ;;  %v569_v46 = vld [vmem:[%s7873_s11 + $0x10] sm:$0xff] }
 0x1a1   :  { %v261_v53 = vpop.f32.mrb[3].mxu0  ;;  %6343 = vmatprep.subr.bf16.mxu1 %v6342_v51 }
 0x1a2   :  { %5607 = vmatprep.mubr.msk.f32.mxu1 %vm301_vm10, %v261_v53 }
 0x1a3   :  { %5608 = vmatmul.mubr.msk.f32.gmra.mrb[2].mxu1 %vm301_vm10, %v5589_v52 }
 0x1a4   :  { %v5592_v54 = vpop.f32.mrb[4].mxu0  ;;  %6345 = vmatpush3.bf16.msra.mxu1 %v6342_v51  ;;  %v552_v51 = vld [vmem:[%s7867_s5 + $0x8] sm:$0xff] }
 0x1a5   :  { %v271_v55 = vpop.f32.mrb[5].mxu0  ;;  %6358 = vmatprep.subr.bf16.mxu1 %v6940_v61 }
 0x1a6   :  { %5610 = vmatprep.mubr.msk.f32.mxu1 %vm301_vm10, %v271_v55 }
 0x1a7   :  { %5611 = vmatmul.mubr.msk.f32.gmra.mrb[4].mxu1 %vm301_vm10, %v5592_v54 }
 0x1a8   :  { %v5595_v56 = vpop.f32.mrb[6].mxu0 }
 0x1a9   :  { %v281_v57 = vpop.f32.mrb[7].mxu0 }
 0x1aa   :  { %5613 = vmatprep.mubr.msk.f32.mxu1 %vm301_vm10, %v281_v57 }
 0x1ab   :  { %5614 = vmatmul.mubr.msk.f32.gmra.mrb[6].mxu1 %vm301_vm10, %v5595_v56 }
 0x1ac   :  { %5624 = vmatprep.mubr.msk.f32.mxu1 %vm301_vm10, %v251_v50  ;;  %v551_v50 = vld [vmem:[%s7867_s5] sm:$0xff] }
 0x1af   :  { %5625 = vmatmul.mubr.msk.f32.vlgmr.msra.gmra.mrb[8].mxu1 %vm301_vm10, %v5586_v49  ;;  %v7277_v49 = vpack.c.bf16 %v570_v47, %v569_v46 }
 0x1b0   :  { %5627 = vmatprep.mubr.msk.f32.mxu1 %vm301_vm10, %v261_v53  ;;  %6360 = vmatpush3.bf16.msra.mxu1 %v7185_v60  ;;  %v553_v53 = vld [vmem:[%s7867_s5 + $0x10] sm:$0xff] }
 0x1b1   :  { %6361 = vmatprep.subr.bf16.mxu1 %v6940_v61 }
 0x1b3   :  { %5628 = vmatmul.mubr.msk.f32.gmra.mrb[10].mxu1 %vm301_vm10, %v5589_v52  ;;  %v7289_v52 = vpack.c.bf16 %v552_v51, %v551_v50 }
 0x1b4   :  { %5630 = vmatprep.mubr.msk.f32.mxu1 %vm301_vm10, %v271_v55  ;;  %6363 = vmatpush3.bf16.msra.mxu1 %v7197_v0 }
 0x1b5   :  { %6370 = vmatprep.subr.bf16.mxu1 %v6940_v61 }
 0x1b7   :  { %5631 = vmatmul.mubr.msk.f32.gmra.mrb[12].mxu1 %vm301_vm10, %v5592_v54  ;;  %v554_v54 = vld [vmem:[%s7867_s5 + $0x18] sm:$0xff] }
 0x1b8   :  { %5633 = vmatprep.mubr.msk.f32.mxu1 %vm301_vm10, %v281_v57  ;;  %v7300_v55 = vpack.c.bf16 %v554_v54, %v553_v53 }
 0x1bb   :  { %5634 = vmatmul.mubr.msk.f32.gmra.mrb[14].mxu1 %vm301_vm10, %v5595_v56 }
 0x1bc   :  { %5666 = vmatprep.mubr.msk.f32.mxu1 %vm6941_vm11, %v6939_v29 }
 0x272   :  { %v5606_v8 = vpop.f32.mrb[0].mxu1 }
 0x273   :  { %v7225_v9 = vadd.f32 %v5606_v8, %v5138_v7  ;;  %v392_v10 = vpop.f32.mrb[1].mxu1 }
 0x274   :  { %v393_v11 = vadd.f32 %v5138_v7, %v392_v10 }
 0x276   :  { %6799 = vtanh.f32 %v393_v11  ;;  %v5609_v12 = vpop.f32.mrb[2].mxu1 }
 0x277   :  { %v7227_v13 = vadd.f32 %v5609_v12, %v5138_v7  ;;  %v402_v14 = vpop.f32.mrb[3].mxu1 }
 0x278   :  { %v7229_v15 = vadd.f32 %v5138_v7, %v402_v14 }
 0x27a   :  { %v5612_v16 = vpop.f32.mrb[4].mxu1 }
 0x27b   :  { %v7231_v17 = vadd.f32 %v5612_v16, %v5138_v7  ;;  %v412_v18 = vpop.f32.mrb[5].mxu1 }
 0x27c   :  { %v7233_v19 = vadd.f32 %v5138_v7, %v412_v18 }
 0x27e   :  { %v5615_v20 = vpop.f32.mrb[6].mxu1 }
 0x27f   :  { %v7235_v21 = vadd.f32 %v5615_v20, %v5138_v7  ;;  %v422_v22 = vpop.f32.mrb[7].mxu1 }
 0x280   :  { %v7237_v23 = vpop.eup %6799  ;;  %v7239_v24 = vadd.f32 %v5138_v7, %v422_v22 }
 0x281   :  { %5667 = vmatmul.mubr.msk.f32.vlgmr.msra.gmra.mrb[16].mxu1 %vm301_vm10, %v7237_v23 }
 0x282   :  { %v5626_v26 = vpop.f32.mrb[8].mxu1  ;;  %6372 = vmatpush3.bf16.msra.mxu1 %v7211_v3  ;;  %5688 = vmatprep.mubr.msk.f32.mxu1 %vm6941_vm11, %v6939_v29 }
 0x283   :  { %v7246_v27 = vadd.f32 %v5626_v26, %v5147_v25  ;;  %v508_v28 = vpop.f32.mrb[9].mxu1  ;;  %6373 = vmatprep.subr.bf16.mxu1 %v6940_v61 }
 0x284   :  { %v7249_v30 = vadd.f32 %v5147_v25, %v508_v28 }
 0x286   :  { %v5629_v31 = vpop.f32.mrb[10].mxu1  ;;  %6375 = vmatpush3.bf16.msra.mxu1 %v7221_v6 }
 0x287   :  { %v7252_v32 = vadd.f32 %v5629_v31, %v5147_v25  ;;  %v518_v33 = vpop.f32.mrb[11].mxu1  ;;  %6382 = vmatprep.subr.bf16.mxu1 %v6940_v61 }
 0x288   :  { %v7255_v34 = vadd.f32 %v5147_v25, %v518_v33 }
 0x28a   :  { %v5632_v35 = vpop.f32.mrb[12].mxu1 }
 0x28b   :  { %v7257_v36 = vadd.f32 %v5632_v35, %v5147_v25  ;;  %v528_v37 = vpop.f32.mrb[13].mxu1 }
 0x28c   :  { %v7259_v38 = vadd.f32 %v5147_v25, %v528_v37 }
 0x28e   :  { %v5635_v39 = vpop.f32.mrb[14].mxu1 }
 0x28f   :  { %v544_v40 = vadd.f32 %v5635_v39, %v5147_v25  ;;  %v538_v41 = vpop.f32.mrb[15].mxu1 }
 0x290   :  { %v539_v42 = vadd.f32 %v5147_v25, %v538_v41 }
 0x291   :  { %6801 = vtanh.f32 %v544_v40 }
 0x29b   :  { %v6802_v48 = vpop.eup %6801 }
 0x29c   :  { %5645 = vmatmul.mubr.msk.f32.vlgmr.msra.gmra.mrb[8].mxu0 %vm301_vm10, %v6802_v48 }
 0x29d   :  { %6354 = vmatpush3.bf16.msra.mxu0 %v7267_v45  ;;  %5655 = vmatprep.mubr.msk.f32.mxu0 %vm6941_vm11, %v6939_v29 }
 0x29e   :  { %6355 = vmatprep.subr.bf16.mxu0 %v6940_v61 }
 0x2a1   :  { %6357 = vmatpush3.bf16.msra.mxu0 %v7277_v49 }
 0x2a2   :  { %6364 = vmatprep.subr.bf16.mxu0 %v6940_v61 }
 0x2a4   :  { %5656 = vmatmul.mubr.msk.f32.vlgmr.msra.gmra.mrb[10].mxu0 %vm301_vm10, %v6802_v48 }
 0x2a5   :  { %6366 = vmatpush3.bf16.msra.mxu0 %v7289_v52  ;;  %5677 = vmatprep.mubr.msk.f32.mxu0 %vm6941_vm11, %v6939_v29 }
 0x2a6   :  { %6367 = vmatprep.subr.bf16.mxu0 %v6940_v61 }
 0x2a9   :  { %6369 = vmatpush3.bf16.msra.mxu0 %v7300_v55 }
 0x2aa   :  { %6376 = vmatprep.subr.bf16.mxu0 %v6940_v61 }
 0x2ac   :  { %5678 = vmatmul.mubr.msk.f32.vlgmr.msra.gmra.mrb[12].mxu0 %vm301_vm10, %v6802_v48 }
 0x2ad   :  { %6378 = vmatpush3.bf16.msra.mxu0 %v7267_v45  ;;  %5699 = vmatprep.mubr.msk.f32.mxu0 %vm6941_vm11, %v6939_v29 }
 0x2ae   :  { %6379 = vmatprep.subr.bf16.mxu0 %v6940_v61 }
 0x2b1   :  { %6381 = vmatpush3.bf16.msra.mxu0 %v7277_v49 }
 0x2b2   :  { %6388 = vmatprep.subr.bf16.mxu0 %v6940_v61 }
 0x354   :  { %v787_v56 = vpop.f32.mrb[16].mxu1 }
 0x355   :  { %v791_v57 = vadd.f32 %v787_v56, %v7225_v9  ;;  %v5668_v58 = vpop.f32.mrb[17].mxu1 }
 0x356   :  { %v563_v58 = vld [vmem:[%s7872_s10] sm:$0xff] }
 0x377   :  { %v7315_v59 = vpop.f32.mrb[10].mxu0 }
 0x378   :  { %v5657_v62 = vpop.f32.mrb[11].mxu0 }
 0x379   :  { %v564_v62 = vld [vmem:[%s7872_s10 + $0x8] sm:$0xff] }
 0x37f   :  { %v858_v63 = vpop.f32.mrb[12].mxu0 }
 0x380   :  { %v862_v1 = vadd.f32 %v858_v63, %v539_v42  ;;  %v5679_v2 = vpop.f32.mrb[13].mxu0  ;;  %v7549_v63 = vpack.c.bf16 %v564_v62, %v563_v58 }
 0x381   :  { %v566_v2 = vld [vmem:[%s7872_s10 + $0x18] sm:$0xff] }
 0x382   :  { %6803 = vtanh.f32 %v862_v1  ;;  %v565_v1 = vld [vmem:[%s7872_s10 + $0x10] sm:$0xff] }
 0x383   :  { %6805 = vtanh.f32 %v791_v57 }
 0x38c   :  { %v6804_v4 = vpop.eup %6803 }
 0x38d   :  { %5689 = vmatmul.mubr.msk.f32.vlgmr.msra.gmra.mrb[18].mxu1 %vm301_vm10, %v6804_v4  ;;  %5700 = vmatmul.mubr.msk.f32.vlgmr.msra.gmra.mrb[14].mxu0 %vm301_vm10, %v6804_v4  ;;  %v7331_v5 = vpop.eup %6805 }
 0x38e   :  { %6384 = vmatpush3.bf16.msra.mxu1 %v7185_v60  ;;  %6390 = vmatpush3.bf16.msra.mxu0 %v7289_v52 }
 0x38f   :  { %6385 = vmatprep.subr.bf16.mxu1 %v6940_v61  ;;  %6391 = vmatprep.subr.bf16.mxu0 %v6940_v61 }
 0x390   :  { %5710 = vmatprep.mubr.msk.f32.mxu1 %vm6941_vm11, %v6939_v29  ;;  %5721 = vmatprep.mubr.msk.f32.mxu0 %vm6941_vm11, %v6939_v29 }
 0x392   :  { %6387 = vmatpush3.bf16.msra.mxu1 %v7197_v0  ;;  %6393 = vmatpush3.bf16.msra.mxu0 %v7300_v55 }
 0x393   :  { %6394 = vmatprep.subr.bf16.mxu1 %v6940_v61  ;;  %6400 = vmatprep.subr.bf16.mxu0 %v6940_v61 }
 0x395   :  { %5711 = vmatmul.mubr.msk.f32.vlgmr.msra.gmra.mrb[20].mxu1 %vm301_vm10, %v7331_v5  ;;  %5722 = vmatmul.mubr.msk.f32.vlgmr.msra.gmra.mrb[16].mxu0 %vm301_vm10, %v6804_v4 }
 0x396   :  { %6396 = vmatpush3.bf16.msra.mxu1 %v7211_v3  ;;  %6402 = vmatpush3.bf16.msra.mxu0 %v7267_v45 }
 0x397   :  { %6397 = vmatprep.subr.bf16.mxu1 %v6940_v61  ;;  %6403 = vmatprep.subr.bf16.mxu0 %v6940_v61 }
 0x398   :  { %5732 = vmatprep.mubr.msk.f32.mxu1 %vm6941_vm11, %v6939_v29  ;;  %5743 = vmatprep.mubr.msk.f32.mxu0 %vm6941_vm11, %v6939_v29 }
 0x39a   :  { %6399 = vmatpush3.bf16.msra.mxu1 %v7221_v6  ;;  %6405 = vmatpush3.bf16.msra.mxu0 %v7277_v49 }
 0x39b   :  { %6406 = vmatprep.subr.bf16.mxu1 %v6940_v61  ;;  %6412 = vmatprep.subr.bf16.mxu0 %v6940_v61 }
 0x468   :  { %v1077_v7 = vpop.f32.mrb[20].mxu1  ;;  %v1148_v8 = vpop.f32.mrb[16].mxu0 }
 0x469   :  { %v1081_v9 = vadd.f32 %v1077_v7, %v7229_v15  ;;  %v1152_v10 = vadd.f32 %v1148_v8, %v7257_v36  ;;  %v5712_v11 = vpop.f32.mrb[21].mxu1  ;;  %v5723_v12 = vpop.f32.mrb[17].mxu0  ;;  %v7567_v7 = vpack.c.bf16 %v566_v2, %v565_v1  ;;  %v3901_v8 = vld [vmem:[%s7874_s12 + $0x10] sm:$0xff] }
 0x46a   :  { %v3903_v12 = vld [vmem:[#allocation6] sm:$0xff] }
 0x46b   :  { %6807 = vtanh.f32 %v1152_v10  ;;  %v3902_v10 = vld [vmem:[%s7874_s12 + $0x18] sm:$0xff] }
 0x46c   :  { %6809 = vtanh.f32 %v1081_v9  ;;  %v7698_v11 = vpack.c.bf16 %v3902_v10, %v3901_v8 }
 0x475   :  { %v6808_v14 = vpop.eup %6807 }
 0x476   :  { %5733 = vmatmul.mubr.msk.f32.vlgmr.msra.gmra.mrb[22].mxu1 %vm301_vm10, %v6808_v14  ;;  %5744 = vmatmul.mubr.msk.f32.vlgmr.msra.gmra.mrb[18].mxu0 %vm301_vm10, %v6808_v14  ;;  %v7364_v15 = vpop.eup %6809 }
 0x477   :  { %6408 = vmatpush3.bf16.msra.mxu1 %v7185_v60  ;;  %6414 = vmatpush3.bf16.msra.mxu0 %v7289_v52 }
 0x478   :  { %6409 = vmatprep.subr.bf16.mxu1 %v6940_v61  ;;  %6415 = vmatprep.subr.bf16.mxu0 %v6940_v61 }
 0x479   :  { %5754 = vmatprep.mubr.msk.f32.mxu1 %vm6941_vm11, %v6939_v29  ;;  %5765 = vmatprep.mubr.msk.f32.mxu0 %vm6941_vm11, %v6939_v29 }
 0x47b   :  { %6411 = vmatpush3.bf16.msra.mxu1 %v7197_v0  ;;  %6417 = vmatpush3.bf16.msra.mxu0 %v7300_v55 }
 0x47c   :  { %6418 = vmatprep.subr.bf16.mxu1 %v6940_v61  ;;  %6424 = vmatprep.subr.bf16.mxu0 %v6940_v61 }
 0x47e   :  { %5755 = vmatmul.mubr.msk.f32.vlgmr.msra.gmra.mrb[24].mxu1 %vm301_vm10, %v7364_v15  ;;  %5766 = vmatmul.mubr.msk.f32.vlgmr.msra.gmra.mrb[20].mxu0 %vm301_vm10, %v6808_v14  ;;  %v3904_v14 = vld [vmem:[#allocation6 + $0x8] sm:$0xff] }
 0x47f   :  { %6420 = vmatpush3.bf16.msra.mxu1 %v7211_v3  ;;  %6426 = vmatpush3.bf16.msra.mxu0 %v7267_v45 }
 0x480   :  { %6421 = vmatprep.subr.bf16.mxu1 %v6940_v61  ;;  %6427 = vmatprep.subr.bf16.mxu0 %v6940_v61 }
 0x481   :  { %5776 = vmatprep.mubr.msk.f32.mxu1 %vm6941_vm11, %v6939_v29  ;;  %5787 = vmatprep.mubr.msk.f32.mxu0 %vm6941_vm11, %v6939_v29 }
 0x483   :  { %6423 = vmatpush3.bf16.msra.mxu1 %v7221_v6  ;;  %6429 = vmatpush3.bf16.msra.mxu0 %v7277_v49 }
 0x484   :  { %6430 = vmatprep.subr.bf16.mxu1 %v6940_v61  ;;  %6436 = vmatprep.subr.bf16.mxu0 %v6940_v61 }
 0x551   :  { %v1367_v16 = vpop.f32.mrb[24].mxu1  ;;  %v1438_v18 = vpop.f32.mrb[20].mxu0 }
 0x552   :  { %v1371_v20 = vadd.f32 %v1367_v16, %v7227_v13  ;;  %v1442_v22 = vadd.f32 %v1438_v18, %v7259_v38  ;;  %v5756_v25 = vpop.f32.mrb[25].mxu1  ;;  %v5767_v26 = vpop.f32.mrb[21].mxu0  ;;  %v7703_v16 = vpack.c.bf16 %v3904_v14, %v3903_v12  ;;  %v3906_v18 = vld [vmem:[#allocation6 + $0x18] sm:$0xff] }
 0x553   :  { %v7714_v26 = vld [vmem:[%s7876_s14] ss:$0 sm:$0xff] }
 0x554   :  { %6811 = vtanh.f32 %v1442_v22 }
 0x555   :  { %6813 = vtanh.f32 %v1371_v20 }
 0x55e   :  { %v6812_v28 = vpop.eup %6811 }
 0x55f   :  { %5777 = vmatmul.mubr.msk.f32.vlgmr.msra.gmra.mrb[26].mxu1 %vm301_vm10, %v6812_v28  ;;  %5788 = vmatmul.mubr.msk.f32.vlgmr.msra.gmra.mrb[22].mxu0 %vm301_vm10, %v6812_v28  ;;  %v7397_v13 = vpop.eup %6813 }
 0x560   :  { %6432 = vmatpush3.bf16.msra.mxu1 %v7185_v60  ;;  %6438 = vmatpush3.bf16.msra.mxu0 %v7289_v52 }
 0x561   :  { %6433 = vmatprep.subr.bf16.mxu1 %v6940_v61  ;;  %6439 = vmatprep.subr.bf16.mxu0 %v6940_v61 }
 0x562   :  { %5798 = vmatprep.mubr.msk.f32.mxu1 %vm6941_vm11, %v6939_v29  ;;  %5809 = vmatprep.mubr.msk.f32.mxu0 %vm6941_vm11, %v6939_v29 }
 0x564   :  { %6435 = vmatpush3.bf16.msra.mxu1 %v7197_v0  ;;  %6441 = vmatpush3.bf16.msra.mxu0 %v7300_v55 }
 0x565   :  { %6442 = vmatprep.subr.bf16.mxu1 %v6940_v61  ;;  %6448 = vmatprep.subr.bf16.mxu0 %v6940_v61 }
 0x567   :  { %5799 = vmatmul.mubr.msk.f32.vlgmr.msra.gmra.mrb[28].mxu1 %vm301_vm10, %v7397_v13  ;;  %5810 = vmatmul.mubr.msk.f32.vlgmr.msra.gmra.mrb[24].mxu0 %vm301_vm10, %v6812_v28 }
 0x568   :  { %6444 = vmatpush3.bf16.msra.mxu1 %v7211_v3  ;;  %6450 = vmatpush3.bf16.msra.mxu0 %v7267_v45 }
 0x569   :  { %6445 = vmatprep.subr.bf16.mxu1 %v6940_v61  ;;  %6451 = vmatprep.subr.bf16.mxu0 %v6940_v61 }
 0x56a   :  { %5820 = vmatprep.mubr.msk.f32.mxu1 %vm6941_vm11, %v6939_v29  ;;  %5831 = vmatprep.mubr.msk.f32.mxu0 %vm6941_vm11, %v6939_v29 }
 0x56c   :  { %6447 = vmatpush3.bf16.msra.mxu1 %v7221_v6  ;;  %6453 = vmatpush3.bf16.msra.mxu0 %v7277_v49 }
 0x56d   :  { %6454 = vmatprep.subr.bf16.mxu1 %v6940_v61  ;;  %6460 = vmatprep.subr.bf16.mxu0 %v6940_v61 }
 0x63a   :  { %v1657_v31 = vpop.f32.mrb[28].mxu1  ;;  %v1728_v33 = vpop.f32.mrb[24].mxu0 }
 0x63b   :  { %v1661_v35 = vadd.f32 %v1657_v31, %v7233_v19  ;;  %v1732_v36 = vadd.f32 %v1728_v33, %v7252_v32  ;;  %v5800_v37 = vpop.f32.mrb[29].mxu1  ;;  %v5811_v38 = vpop.f32.mrb[25].mxu0 }
 0x63d   :  { %6815 = vtanh.f32 %v1732_v36  ;;  %v7727_v36 = vld [vmem:[%s7877_s15] ss:$0 sm:$0xff] }
 0x63e   :  { %6817 = vtanh.f32 %v1661_v35 }
 0x647   :  { %v6816_v39 = vpop.eup %6815 }
 0x648   :  { %5821 = vmatmul.mubr.msk.f32.vlgmr.msra.gmra.mrb[30].mxu1 %vm301_vm10, %v6816_v39  ;;  %5832 = vmatmul.mubr.msk.f32.vlgmr.msra.gmra.mrb[26].mxu0 %vm301_vm10, %v6816_v39  ;;  %v7430_v19 = vpop.eup %6817 }
 0x649   :  { %6456 = vmatpush3.bf16.msra.mxu1 %v7185_v60  ;;  %6462 = vmatpush3.bf16.msra.mxu0 %v7289_v52 }
 0x64a   :  { %6457 = vmatprep.subr.bf16.mxu1 %v6940_v61  ;;  %6463 = vmatprep.subr.bf16.mxu0 %v6940_v61 }
 0x64b   :  { %5842 = vmatprep.mubr.msk.f32.mxu1 %vm6941_vm11, %v6939_v29  ;;  %5853 = vmatprep.mubr.msk.f32.mxu0 %vm6941_vm11, %v6939_v29 }
 0x64d   :  { %6459 = vmatpush3.bf16.msra.mxu1 %v7197_v0  ;;  %6465 = vmatpush3.bf16.msra.mxu0 %v7300_v55 }
 0x64e   :  { %6466 = vmatprep.subr.bf16.mxu1 %v6940_v61  ;;  %6472 = vmatprep.subr.bf16.mxu0 %v6940_v61 }
 0x650   :  { %5843 = vmatmul.mubr.msk.f32.vlgmr.msra.gmra.mrb[32].mxu1 %vm301_vm10, %v7430_v19  ;;  %5854 = vmatmul.mubr.msk.f32.vlgmr.msra.gmra.mrb[28].mxu0 %vm301_vm10, %v6816_v39 }
 0x651   :  { %6468 = vmatpush3.bf16.msra.mxu1 %v7211_v3  ;;  %6474 = vmatpush3.bf16.msra.mxu0 %v7267_v45 }
 0x652   :  { %6469 = vmatprep.subr.bf16.mxu1 %v6940_v61  ;;  %6475 = vmatprep.subr.bf16.mxu0 %v6940_v61 }
 0x653   :  { %5864 = vmatprep.mubr.msk.f32.mxu1 %vm6941_vm11, %v6939_v29  ;;  %5875 = vmatprep.mubr.msk.f32.mxu0 %vm6941_vm11, %v6939_v29 }
 0x655   :  { %6471 = vmatpush3.bf16.msra.mxu1 %v7221_v6  ;;  %6477 = vmatpush3.bf16.msra.mxu0 %v7277_v49 }
 0x656   :  { %6478 = vmatprep.subr.bf16.mxu1 %v6940_v61  ;;  %6484 = vmatprep.subr.bf16.mxu0 %v6940_v61 }
 0x723   :  { %v1947_v32 = vpop.f32.mrb[32].mxu1  ;;  %v2018_v40 = vpop.f32.mrb[28].mxu0 }
 0x724   :  { %v1951_v41 = vadd.f32 %v1947_v32, %v7231_v17  ;;  %v2022_v42 = vadd.f32 %v2018_v40, %v7255_v34  ;;  %v5844_v43 = vpop.f32.mrb[33].mxu1  ;;  %v5855_v44 = vpop.f32.mrb[29].mxu0 }
 0x726   :  { %6819 = vtanh.f32 %v2022_v42 }
 0x727   :  { %6821 = vtanh.f32 %v1951_v41 }
 0x730   :  { %v6820_v46 = vpop.eup %6819 }
 0x731   :  { %5865 = vmatmul.mubr.msk.f32.vlgmr.msra.gmra.mrb[34].mxu1 %vm301_vm10, %v6820_v46  ;;  %5876 = vmatmul.mubr.msk.f32.vlgmr.msra.gmra.mrb[30].mxu0 %vm301_vm10, %v6820_v46  ;;  %v7463_v17 = vpop.eup %6821 }
 0x732   :  { %6480 = vmatpush3.bf16.msra.mxu1 %v7185_v60  ;;  %6486 = vmatpush3.bf16.msra.mxu0 %v7289_v52 }
 0x733   :  { %6481 = vmatprep.subr.bf16.mxu1 %v6940_v61  ;;  %6487 = vmatprep.subr.bf16.mxu0 %v6940_v61 }
 0x734   :  { %5886 = vmatprep.mubr.msk.f32.mxu1 %vm6941_vm11, %v6939_v29  ;;  %5897 = vmatprep.mubr.msk.f32.mxu0 %vm6941_vm11, %v6939_v29 }
 0x736   :  { %6483 = vmatpush3.bf16.msra.mxu1 %v7197_v0  ;;  %6489 = vmatpush3.bf16.msra.mxu0 %v7300_v55 }
 0x737   :  { %6490 = vmatprep.subr.bf16.mxu1 %v6940_v61  ;;  %6496 = vmatprep.subr.bf16.mxu0 %v6940_v61 }
 0x739   :  { %5887 = vmatmul.mubr.msk.f32.vlgmr.msra.gmra.mrb[36].mxu1 %vm301_vm10, %v7463_v17  ;;  %5898 = vmatmul.mubr.msk.f32.vlgmr.msra.gmra.mrb[32].mxu0 %vm301_vm10, %v6820_v46 }
 0x73a   :  { %6492 = vmatpush3.bf16.msra.mxu1 %v7211_v3  ;;  %6498 = vmatpush3.bf16.msra.mxu0 %v7267_v45 }
 0x73b   :  { %6493 = vmatprep.subr.bf16.mxu1 %v6940_v61  ;;  %6499 = vmatprep.subr.bf16.mxu0 %v6940_v61 }
 0x73c   :  { %5908 = vmatprep.mubr.msk.f32.mxu1 %vm6941_vm11, %v6939_v29  ;;  %5919 = vmatprep.mubr.msk.f32.mxu0 %vm6941_vm11, %v6939_v29 }
 0x73e   :  { %6495 = vmatpush3.bf16.msra.mxu1 %v7221_v6  ;;  %6501 = vmatpush3.bf16.msra.mxu0 %v7277_v49 }
 0x73f   :  { %6502 = vmatprep.subr.bf16.mxu1 %v6940_v61  ;;  %6508 = vmatprep.subr.bf16.mxu0 %v6940_v61 }
 0x80c   :  { %v2237_v34 = vpop.f32.mrb[36].mxu1  ;;  %v2308_v47 = vpop.f32.mrb[32].mxu0 }
 0x80d   :  { %v2241_v48 = vadd.f32 %v2237_v34, %v7239_v24  ;;  %v2312_v50 = vadd.f32 %v2308_v47, %v7246_v27  ;;  %v5888_v51 = vpop.f32.mrb[37].mxu1  ;;  %v5899_v53 = vpop.f32.mrb[33].mxu0 }
 0x80f   :  { %6823 = vtanh.f32 %v2312_v50 }
 0x810   :  { %6825 = vtanh.f32 %v2241_v48 }
 0x819   :  { %v6824_v54 = vpop.eup %6823 }
 0x81a   :  { %5909 = vmatmul.mubr.msk.f32.vlgmr.msra.gmra.mrb[38].mxu1 %vm301_vm10, %v6824_v54  ;;  %5920 = vmatmul.mubr.msk.f32.vlgmr.msra.gmra.mrb[34].mxu0 %vm301_vm10, %v6824_v54 }
 0x81b   :  { %6504 = vmatpush3.bf16.msra.mxu1 %v7185_v60  ;;  %6510 = vmatpush3.bf16.msra.mxu0 %v7289_v52  ;;  %v7496_v60 = vpop.eup %6825 }
 0x81c   :  { %6505 = vmatprep.subr.bf16.mxu1 %v6940_v61  ;;  %6511 = vmatprep.subr.bf16.mxu0 %v6940_v61 }
 0x81d   :  { %5930 = vmatprep.mubr.msk.f32.mxu1 %vm6941_vm11, %v6939_v29  ;;  %5941 = vmatprep.mubr.msk.f32.mxu0 %vm6941_vm11, %v6939_v29 }
 0x81f   :  { %6507 = vmatpush3.bf16.msra.mxu1 %v7197_v0  ;;  %6513 = vmatpush3.bf16.msra.mxu0 %v7300_v55  ;;  %v555_v55 = vld [vmem:[%s7870_s8] sm:$0xff] }
 0x820   :  { %6514 = vmatprep.subr.bf16.mxu1 %v6940_v61  ;;  %6520 = vmatprep.subr.bf16.mxu0 %v6940_v61 }
 0x822   :  { %5931 = vmatmul.mubr.msk.f32.vlgmr.msra.gmra.mrb[40].mxu1 %vm301_vm10, %v7496_v60  ;;  %5942 = vmatmul.mubr.msk.f32.vlgmr.msra.gmra.mrb[36].mxu0 %vm301_vm10, %v6824_v54 }
 0x823   :  { %6516 = vmatpush3.bf16.msra.mxu1 %v7211_v3  ;;  %6522 = vmatpush3.bf16.msra.mxu0 %v7267_v45 }
 0x824   :  { %6517 = vmatprep.subr.bf16.mxu1 %v6940_v61  ;;  %6523 = vmatprep.subr.bf16.mxu0 %v6940_v61 }
 0x825   :  { %5952 = vmatprep.mubr.msk.f32.mxu1 %vm6941_vm11, %v6939_v29  ;;  %5963 = vmatprep.mubr.msk.f32.mxu0 %vm6941_vm11, %v6939_v29 }
 0x827   :  { %6519 = vmatpush3.bf16.msra.mxu1 %v7221_v6  ;;  %6525 = vmatpush3.bf16.msra.mxu0 %v7277_v49  ;;  %v556_v6 = vld [vmem:[%s7870_s8 + $0x8] sm:$0xff] }
 0x828   :  { %6526 = vmatprep.subr.bf16.mxu1 %v6940_v61  ;;  %6568 = vmatprep.subr.bf16.mxu0 %v6940_v61  ;;  %v7521_v49 = vpack.c.bf16 %v556_v6, %v555_v55 }
 0x8f5   :  { %v2527_v0 = vpop.f32.mrb[40].mxu1  ;;  %v2598_v3 = vpop.f32.mrb[36].mxu0 }
 0x8f6   :  { %v2531_v24 = vadd.f32 %v2527_v0, %v7235_v21  ;;  %v2602_v27 = vadd.f32 %v2598_v3, %v7249_v30  ;;  %v5932_v45 = vpop.f32.mrb[41].mxu1  ;;  %v5943_v52 = vpop.f32.mrb[37].mxu0  ;;  %v557_v21 = vld [vmem:[%s7870_s8 + $0x10] sm:$0xff]  ;;  %v558_v30 = vld [vmem:[%s7870_s8 + $0x18] sm:$0xff] }
 0x8f7   :  { %v7533_v57 = vpack.c.bf16 %v558_v30, %v557_v21 }
 0x8f8   :  { %6827 = vtanh.f32 %v2602_v27 }
 0x8f9   :  { %6829 = vtanh.f32 %v2531_v24 }
 0x902   :  { %v6828_v56 = vpop.eup %6827 }
 0x903   :  { %5953 = vmatmul.mubr.msk.f32.vlgmr.msra.gmra.mrb[42].mxu1 %vm301_vm10, %v6828_v56  ;;  %5964 = vmatmul.mubr.msk.f32.vlgmr.msra.gmra.mrb[38].mxu0 %vm301_vm10, %v6828_v56  ;;  %v7559_v4 = vpop.eup %6829 }
 0x904   :  { %6528 = vmatpush3.bf16.msra.mxu1 %v7521_v49  ;;  %6570 = vmatpush3.bf16.msra.mxu0 %v7521_v49 }
 0x905   :  { %6529 = vmatprep.subr.bf16.mxu1 %v6940_v61  ;;  %6571 = vmatprep.subr.bf16.mxu0 %v6940_v61 }
 0x906   :  { %5974 = vmatprep.mubr.msk.f32.mxu1 %vm6941_vm11, %v6939_v29  ;;  %6051 = vmatprep.mubr.msk.f32.mxu0 %vm6941_vm11, %v6939_v29 }
 0x908   :  { %6531 = vmatpush3.bf16.msra.mxu1 %v7533_v57  ;;  %6573 = vmatpush3.bf16.msra.mxu0 %v7533_v57 }
 0x909   :  { %6532 = vmatprep.subr.bf16.mxu1 %v6940_v61  ;;  %6574 = vmatprep.subr.bf16.mxu0 %v6940_v61 }
 0x90b   :  { %5975 = vmatmul.mubr.msk.f32.vlgmr.msra.gmra.mrb[44].mxu1 %vm301_vm10, %v7237_v23  ;;  %6052 = vmatmul.mubr.msk.f32.vlgmr.msra.gmra.mrb[8].mxu0 %vm301_vm10, %v7559_v4 }
 0x90c   :  { %6534 = vmatpush3.bf16.msra.mxu1 %v7521_v49  ;;  %6576 = vmatpush3.bf16.msra.mxu0 %v7549_v63 }
 0x90d   :  { %6535 = vmatprep.subr.bf16.mxu1 %v6940_v61  ;;  %6577 = vmatprep.subr.bf16.mxu0 %v6940_v61 }
 0x90e   :  { %5985 = vmatprep.mubr.msk.f32.mxu1 %vm6941_vm11, %v6939_v29  ;;  %6062 = vmatprep.mubr.msk.f32.mxu0 %vm6941_vm11, %v6939_v29 }
 0x910   :  { %6537 = vmatpush3.bf16.msra.mxu1 %v7533_v57  ;;  %6579 = vmatpush3.bf16.msra.mxu0 %v7567_v7 }
 0x911   :  { %6538 = vmatprep.subr.bf16.mxu1 %v6940_v61  ;;  %6580 = vmatprep.subr.bf16.mxu0 %v6940_v61 }
 0x913   :  { %5986 = vmatmul.mubr.msk.f32.vlgmr.msra.gmra.mrb[38].mxu1 %vm301_vm10, %v7331_v5  ;;  %6063 = vmatmul.mubr.msk.f32.vlgmr.msra.gmra.mrb[38].mxu0 %vm301_vm10, %v7237_v23  ;;  %v3899_v23 = vld [vmem:[%s7874_s12] sm:$0xff] }
 0x914   :  { %6540 = vmatpush3.bf16.msra.mxu1 %v7521_v49  ;;  %6582 = vmatpush3.bf16.msra.mxu0 %v7549_v63 }
 0x915   :  { %6541 = vmatprep.subr.bf16.mxu1 %v6940_v61  ;;  %6583 = vmatprep.subr.bf16.mxu0 %v6940_v61 }
 0x916   :  { %5996 = vmatprep.mubr.msk.f32.mxu1 %vm6941_vm11, %v6939_v29  ;;  %6073 = vmatprep.mubr.msk.f32.mxu0 %vm6941_vm11, %v6939_v29 }
 0x918   :  { %6543 = vmatpush3.bf16.msra.mxu1 %v7533_v57  ;;  %6585 = vmatpush3.bf16.msra.mxu0 %v7567_v7 }
 0x919   :  { %6544 = vmatprep.subr.bf16.mxu1 %v6940_v61  ;;  %6586 = vmatprep.subr.bf16.mxu0 %v6940_v61 }
 0x91b   :  { %5997 = vmatmul.mubr.msk.f32.vlgmr.msra.gmra.mrb[34].mxu1 %vm301_vm10, %v7364_v15  ;;  %6074 = vmatmul.mubr.msk.f32.vlgmr.msra.gmra.mrb[34].mxu0 %vm301_vm10, %v7331_v5  ;;  %v3900_v5 = vld [vmem:[%s7874_s12 + $0x8] sm:$0xff] }
 0x91c   :  { %6546 = vmatpush3.bf16.msra.mxu1 %v7521_v49  ;;  %6588 = vmatpush3.bf16.msra.mxu0 %v7549_v63  ;;  %v7692_v9 = vpack.c.bf16 %v3900_v5, %v3899_v23 }
 0x91d   :  { %6547 = vmatprep.subr.bf16.mxu1 %v6940_v61  ;;  %6589 = vmatprep.subr.bf16.mxu0 %v6940_v61 }
 0x91e   :  { %6007 = vmatprep.mubr.msk.f32.mxu1 %vm6941_vm11, %v6939_v29  ;;  %6084 = vmatprep.mubr.msk.f32.mxu0 %vm6941_vm11, %v6939_v29 }
 0x920   :  { %6549 = vmatpush3.bf16.msra.mxu1 %v7533_v57  ;;  %6591 = vmatpush3.bf16.msra.mxu0 %v7567_v7 }
 0x921   :  { %6550 = vmatprep.subr.bf16.mxu1 %v6940_v61  ;;  %6592 = vmatprep.subr.bf16.mxu0 %v6940_v61 }
 0x923   :  { %6008 = vmatmul.mubr.msk.f32.vlgmr.msra.gmra.mrb[30].mxu1 %vm301_vm10, %v7397_v13  ;;  %6085 = vmatmul.mubr.msk.f32.vlgmr.msra.gmra.mrb[30].mxu0 %vm301_vm10, %v7364_v15  ;;  %v3905_v15 = vld [vmem:[#allocation6 + $0x10] sm:$0xff] }
 0x924   :  { %6552 = vmatpush3.bf16.msra.mxu1 %v7521_v49  ;;  %6594 = vmatpush3.bf16.msra.mxu0 %v7549_v63  ;;  %v7706_v20 = vpack.c.bf16 %v3906_v18, %v3905_v15 }
 0x925   :  { %6553 = vmatprep.subr.bf16.mxu1 %v6940_v61  ;;  %6595 = vmatprep.subr.bf16.mxu0 %v6940_v61 }
 0x926   :  { %6018 = vmatprep.mubr.msk.f32.mxu1 %vm6941_vm11, %v6939_v29  ;;  %6095 = vmatprep.mubr.msk.f32.mxu0 %vm6941_vm11, %v6939_v29 }
 0x928   :  { %6555 = vmatpush3.bf16.msra.mxu1 %v7533_v57  ;;  %6597 = vmatpush3.bf16.msra.mxu0 %v7567_v7 }
 0x929   :  { %6556 = vmatprep.subr.bf16.mxu1 %v6940_v61  ;;  %6598 = vmatprep.subr.bf16.mxu0 %v6940_v61 }
 0x92b   :  { %6019 = vmatmul.mubr.msk.f32.vlgmr.msra.gmra.mrb[26].mxu1 %vm301_vm10, %v7430_v19  ;;  %6096 = vmatmul.mubr.msk.f32.vlgmr.msra.gmra.mrb[26].mxu0 %vm301_vm10, %v7397_v13 }
 0x92c   :  { %6558 = vmatpush3.bf16.msra.mxu1 %v7521_v49  ;;  %6600 = vmatpush3.bf16.msra.mxu0 %v7549_v63 }
 0x92d   :  { %6559 = vmatprep.subr.bf16.mxu1 %v6940_v61  ;;  %6601 = vmatprep.subr.bf16.mxu0 %v6940_v61 }
 0x92e   :  { %6029 = vmatprep.mubr.msk.f32.mxu1 %vm6941_vm11, %v6939_v29  ;;  %6106 = vmatprep.mubr.msk.f32.mxu0 %vm6941_vm11, %v6939_v29 }
 0x930   :  { %6561 = vmatpush3.bf16.msra.mxu1 %v7533_v57  ;;  %6603 = vmatpush3.bf16.msra.mxu0 %v7567_v7 }
 0x931   :  { %6562 = vmatprep.subr.bf16.mxu1 %v6940_v61  ;;  %6604 = vmatprep.subr.bf16.mxu0 %v6940_v61 }
 0x933   :  { %6030 = vmatmul.mubr.msk.f32.vlgmr.msra.gmra.mrb[22].mxu1 %vm301_vm10, %v7463_v17  ;;  %6107 = vmatmul.mubr.msk.f32.vlgmr.msra.gmra.mrb[22].mxu0 %vm301_vm10, %v7430_v19 }
 0x934   :  { %6564 = vmatpush3.bf16.msra.mxu1 %v7521_v49  ;;  %6606 = vmatpush3.bf16.msra.mxu0 %v7549_v63 }
 0x935   :  { %6565 = vmatprep.subr.bf16.mxu1 %v6940_v61  ;;  %6607 = vmatprep.subr.bf16.mxu0 %v6940_v61 }
 0x936   :  { %6040 = vmatprep.mubr.msk.f32.mxu1 %vm6941_vm11, %v6939_v29  ;;  %6117 = vmatprep.mubr.msk.f32.mxu0 %vm6941_vm11, %v6939_v29 }
 0x938   :  { %6567 = vmatpush3.bf16.msra.mxu1 %v7533_v57  ;;  %6609 = vmatpush3.bf16.msra.mxu0 %v7567_v7 }
 0x939   :  { %6610 = vmatprep.subr.bf16.mxu0 %v6940_v61  ;;  %6616 = vmatprep.subr.bf16.mxu1 %v6940_v61 }
 0x93b   :  { %6041 = vmatmul.mubr.msk.f32.vlgmr.msra.gmra.mrb[18].mxu1 %vm301_vm10, %v7496_v60  ;;  %6118 = vmatmul.mubr.msk.f32.vlgmr.msra.gmra.mrb[18].mxu0 %vm301_vm10, %v7463_v17 }
 0x93c   :  { %6612 = vmatpush3.bf16.msra.mxu0 %v7549_v63  ;;  %6618 = vmatpush3.bf16.msra.mxu1 %v7549_v63 }
 0x93d   :  { %6613 = vmatprep.subr.bf16.mxu0 %v6940_v61  ;;  %6619 = vmatprep.subr.bf16.mxu1 %v6940_v61 }
 0x93e   :  { %6128 = vmatprep.mubr.msk.f32.mxu0 %vm6941_vm11, %v6939_v29  ;;  %6139 = vmatprep.mubr.msk.f32.mxu1 %vm6941_vm11, %v6939_v29 }
 0x940   :  { %6615 = vmatpush3.bf16.msra.mxu0 %v7567_v7  ;;  %6621 = vmatpush3.bf16.msra.mxu1 %v7567_v7 }
 0x941   :  { %6622 = vmatprep.subr.bf16.mxu1 %v6940_v61  ;;  %6628 = vmatprep.subr.bf16.mxu0 %v6940_v61 }
 0x943   :  { %6129 = vmatmul.mubr.msk.f32.vlgmr.msra.gmra.mrb[14].mxu0 %vm301_vm10, %v7496_v60  ;;  %6140 = vmatmul.mubr.msk.f32.vlgmr.msra.gmra.mrb[46].mxu1 %vm301_vm10, %v7559_v4 }
 0x944   :  { %6150 = vmatprep.mubr.msk.f32.mxu1 %vm6941_vm11, %v6939_v29  ;;  %6161 = vmatprep.mubr.msk.f32.mxu0 %vm6941_vm11, %v6939_v29 }
 0x945   :  { %6624 = vmatpush3.bf16.msra.mxu1 %v7692_v9  ;;  %6630 = vmatpush3.bf16.msra.mxu0 %v7703_v16 }
 0x946   :  { %6625 = vmatprep.subr.bf16.mxu1 %v6940_v61  ;;  %6631 = vmatprep.subr.bf16.mxu0 %v6940_v61 }
 0x949   :  { %6627 = vmatpush3.bf16.msra.mxu1 %v7698_v11  ;;  %6633 = vmatpush3.bf16.msra.mxu0 %v7706_v20 }
 0x94a   :  { %6634 = vmatprep.subr.bf16.mxu1 %v6940_v61  ;;  %6640 = vmatprep.subr.bf16.mxu0 %v6940_v61 }
 0x9d6   :  { %v2674_v22 = vpop.f32.mrb[42].mxu1 }
 0x9d7   :  { %v5954_v25 = vpop.f32.mrb[43].mxu1 }
 0x9de   :  { %v2814_v28 = vpop.f32.mrb[44].mxu1 }
 0x9df   :  { %v2815_v13 = vadd.f32 %v2814_v28, %v2674_v22  ;;  %v5976_v31 = vpop.f32.mrb[45].mxu1  ;;  %v4963_v28 = vld [vmem:[%s7879_s17] sm:$0xff] }
 0x9e0   :  { %v4966_v31 = vld [vmem:[%s7879_s17 + $0x18] sm:$0xff] }
 0x9e1   :  { %v2824_v33 = vadd.f32 %v7714_v26, %v2815_v13 }
 0x9e3   :  { %6831 = vtanh.f32 %v2824_v33 }
 0x9ed   :  { %v6832_v35 = vpop.eup %6831 }
 0x9ee   :  { %6151 = vmatmul.mubr.msk.f32.vlgmr.msra.gmra.mrb[38].mxu1 %vm301_vm10, %v6832_v35 }
 0x9ef   :  { %6636 = vmatpush3.bf16.msra.mxu1 %v7692_v9  ;;  %6172 = vmatprep.mubr.msk.f32.mxu1 %vm6941_vm11, %v6939_v29 }
 0x9f0   :  { %6637 = vmatprep.subr.bf16.mxu1 %v6940_v61 }
 0x9f3   :  { %6639 = vmatpush3.bf16.msra.mxu1 %v7698_v11 }
 0x9f4   :  { %6646 = vmatprep.subr.bf16.mxu1 %v6940_v61 }
 0xa16   :  { %v3894_v37 = vpop.f32.mrb[46].mxu1 }
 0xa17   :  { %v3895_v38 = vadd.f32 %v3894_v37, %v7315_v59  ;;  %v6141_v39 = vpop.f32.mrb[47].mxu1 }
 0xa19   :  { %v3898_v19 = vadd.f32 %v7727_v36, %v3895_v38 }
 0xa1b   :  { %6833 = vtanh.f32 %v3898_v19 }
 0xa25   :  { %v6834_v32 = vpop.eup %6833 }
 0xa26   :  { %6162 = vmatmul.mubr.msk.f32.vlgmr.msra.gmra.mrb[14].mxu0 %vm301_vm10, %v6834_v32 }
 0xa27   :  { %6642 = vmatpush3.bf16.msra.mxu0 %v7703_v16  ;;  %6183 = vmatprep.mubr.msk.f32.mxu0 %vm6941_vm11, %v6939_v29 }
 0xa28   :  { %6643 = vmatprep.subr.bf16.mxu0 %v6940_v61 }
 0xa2b   :  { %6645 = vmatpush3.bf16.msra.mxu0 %v7706_v20 }
 0xa2c   :  { %6652 = vmatprep.subr.bf16.mxu0 %v6940_v61 }
 0xac1   :  { %v3978_v40 = vpop.f32.mrb[38].mxu1 }
 0xac2   :  { %v6729_v59 = vadd.f32 %v7714_v26, %v3978_v40  ;;  %v6152_v41 = vpop.f32.mrb[39].mxu1  ;;  %v4959_v40 = vld [vmem:[%s7878_s16] sm:$0xff] }
 0xac4   :  { %6835 = vtanh.f32 %v6729_v59  ;;  %v4960_v59 = vld [vmem:[%s7878_s16 + $0x8] sm:$0xff] }
 0xac5   :  { %v6713_v41 = vpack.c.bf16 %v4960_v59, %v4959_v40 }
 0xace   :  { %v6836_v42 = vpop.eup %6835 }
 0xacf   :  { %6173 = vmatmul.mubr.msk.f32.vlgmr.msra.gmra.mrb[34].mxu1 %vm301_vm10, %v6836_v42  ;;  %v4961_v42 = vld [vmem:[%s7878_s16 + $0x10] sm:$0xff] }
 0xad0   :  { %6648 = vmatpush3.bf16.msra.mxu1 %v7692_v9  ;;  %6194 = vmatprep.mubr.msk.f32.mxu1 %vm6941_vm11, %v6939_v29 }
 0xad1   :  { %6649 = vmatprep.subr.bf16.mxu1 %v6940_v61 }
 0xad4   :  { %6651 = vmatpush3.bf16.msra.mxu1 %v7698_v11 }
 0xad5   :  { %6658 = vmatprep.subr.bf16.mxu1 %v6940_v61 }
 0xaf9   :  { %v4052_v43 = vpop.f32.mrb[14].mxu0 }
 0xafa   :  { %v6720_v44 = vadd.f32 %v7727_v36, %v4052_v43  ;;  %v6163_v46 = vpop.f32.mrb[15].mxu0 }
 0xafc   :  { %6837 = vtanh.f32 %v6720_v44 }
 0xb06   :  { %v6838_v17 = vpop.eup %6837 }
 0xb07   :  { %6184 = vmatmul.mubr.msk.f32.vlgmr.msra.gmra.mrb[18].mxu0 %vm301_vm10, %v6838_v17 }
 0xb08   :  { %6654 = vmatpush3.bf16.msra.mxu0 %v7703_v16  ;;  %6205 = vmatprep.mubr.msk.f32.mxu0 %vm6941_vm11, %v6939_v29 }
 0xb09   :  { %6655 = vmatprep.subr.bf16.mxu0 %v6940_v61 }
 0xb0c   :  { %6657 = vmatpush3.bf16.msra.mxu0 %v7706_v20 }
 0xb0d   :  { %6664 = vmatprep.subr.bf16.mxu0 %v6940_v61 }
 0xba2   :  { %v4128_v34 = vpop.f32.mrb[34].mxu1 }
 0xba3   :  { %v6727_v47 = vadd.f32 %v7714_v26, %v4128_v34  ;;  %v6174_v48 = vpop.f32.mrb[35].mxu1 }
 0xba5   :  { %6839 = vtanh.f32 %v6727_v47  ;;  %v5220_v47 = vld [vmem:[%s7880_s18] ss:$0 sm:$0xff] }
 0xbaf   :  { %v6840_v50 = vpop.eup %6839 }
 0xbb0   :  { %6195 = vmatmul.mubr.msk.f32.vlgmr.msra.gmra.mrb[30].mxu1 %vm301_vm10, %v6840_v50 }
 0xbb1   :  { %6660 = vmatpush3.bf16.msra.mxu1 %v7692_v9  ;;  %6216 = vmatprep.mubr.msk.f32.mxu1 %vm6941_vm11, %v6939_v29 }
 0xbb2   :  { %6661 = vmatprep.subr.bf16.mxu1 %v6940_v61 }
 0xbb5   :  { %6663 = vmatpush3.bf16.msra.mxu1 %v7698_v11 }
 0xbb6   :  { %6670 = vmatprep.subr.bf16.mxu1 %v6940_v61 }
 0xbda   :  { %v4202_v51 = vpop.f32.mrb[18].mxu0 }
 0xbdb   :  { %v6722_v53 = vadd.f32 %v7727_v36, %v4202_v51  ;;  %v6185_v54 = vpop.f32.mrb[19].mxu0 }
 0xbdd   :  { %6841 = vtanh.f32 %v6722_v53 }
 0xbe7   :  { %v6842_v60 = vpop.eup %6841 }
 0xbe8   :  { %6206 = vmatmul.mubr.msk.f32.vlgmr.msra.gmra.mrb[22].mxu0 %vm301_vm10, %v6842_v60 }
 0xbe9   :  { %6666 = vmatpush3.bf16.msra.mxu0 %v7703_v16  ;;  %6227 = vmatprep.mubr.msk.f32.mxu0 %vm6941_vm11, %v6939_v29 }
 0xbea   :  { %6667 = vmatprep.subr.bf16.mxu0 %v6940_v61 }
 0xbed   :  { %6669 = vmatpush3.bf16.msra.mxu0 %v7706_v20 }
 0xbee   :  { %6676 = vmatprep.subr.bf16.mxu0 %v6940_v61 }
 0xc83   :  { %v4278_v0 = vpop.f32.mrb[30].mxu1 }
 0xc84   :  { %v6725_v3 = vadd.f32 %v7714_v26, %v4278_v0  ;;  %v6196_v24 = vpop.f32.mrb[31].mxu1 }
 0xc86   :  { %6843 = vtanh.f32 %v6725_v3 }
 0xc90   :  { %v6844_v27 = vpop.eup %6843 }
 0xc91   :  { %6217 = vmatmul.mubr.msk.f32.vlgmr.msra.gmra.mrb[26].mxu1 %vm301_vm10, %v6844_v27 }
 0xc92   :  { %6672 = vmatpush3.bf16.msra.mxu1 %v7692_v9  ;;  %6238 = vmatprep.mubr.msk.f32.mxu1 %vm6941_vm11, %v6939_v29 }
 0xc93   :  { %6673 = vmatprep.subr.bf16.mxu1 %v6940_v61 }
 0xc96   :  { %6675 = vmatpush3.bf16.msra.mxu1 %v7698_v11 }
 0xc97   :  { %6682 = vmatprep.subr.bf16.mxu1 %v6940_v61 }
 0xcbb   :  { %v4352_v45 = vpop.f32.mrb[22].mxu0 }
 0xcbc   :  { %v6724_v52 = vadd.f32 %v7727_v36, %v4352_v45  ;;  %v6207_v55 = vpop.f32.mrb[23].mxu0 }
 0xcbe   :  { %6845 = vtanh.f32 %v6724_v52 }
 0xcc8   :  { %v6846_v6 = vpop.eup %6845 }
 0xcc9   :  { %6228 = vmatmul.mubr.msk.f32.vlgmr.msra.gmra.mrb[26].mxu0 %vm301_vm10, %v6846_v6 }
 0xcca   :  { %6678 = vmatpush3.bf16.msra.mxu0 %v7703_v16  ;;  %6249 = vmatprep.mubr.msk.f32.mxu0 %vm6941_vm11, %v6939_v29 }
 0xccb   :  { %6679 = vmatprep.subr.bf16.mxu0 %v6940_v61 }
 0xcce   :  { %6681 = vmatpush3.bf16.msra.mxu0 %v7706_v20 }
 0xccf   :  { %6688 = vmatprep.subr.bf16.mxu0 %v6940_v61 }
 0xd64   :  { %v4428_v49 = vpop.f32.mrb[26].mxu1 }
 0xd65   :  { %v6723_v21 = vadd.f32 %v7714_v26, %v4428_v49  ;;  %v6218_v30 = vpop.f32.mrb[27].mxu1 }
 0xd67   :  { %6847 = vtanh.f32 %v6723_v21 }
 0xd71   :  { %v6848_v56 = vpop.eup %6847 }
 0xd72   :  { %6239 = vmatmul.mubr.msk.f32.vlgmr.msra.gmra.mrb[22].mxu1 %vm301_vm10, %v6848_v56 }
 0xd73   :  { %6684 = vmatpush3.bf16.msra.mxu1 %v7692_v9  ;;  %6260 = vmatprep.mubr.msk.f32.mxu1 %vm6941_vm11, %v6939_v29 }
 0xd74   :  { %6685 = vmatprep.subr.bf16.mxu1 %v6940_v61 }
 0xd77   :  { %6687 = vmatpush3.bf16.msra.mxu1 %v7698_v11 }
 0xd78   :  { %6706 = vmatprep.subr.bf16.mxu1 %v6940_v61 }
 0xd9c   :  { %v4502_v57 = vpop.f32.mrb[26].mxu0 }
 0xd9d   :  { %v6726_v58 = vadd.f32 %v7727_v36, %v4502_v57  ;;  %v6229_v62 = vpop.f32.mrb[27].mxu0 }
 0xd9f   :  { %6849 = vtanh.f32 %v6726_v58 }
 0xda9   :  { %v6850_v63 = vpop.eup %6849 }
 0xdaa   :  { %6250 = vmatmul.mubr.msk.f32.vlgmr.msra.gmra.mrb[30].mxu0 %vm301_vm10, %v6850_v63 }
 0xdab   :  { %6690 = vmatpush3.bf16.msra.mxu0 %v7703_v16  ;;  %6271 = vmatprep.mubr.msk.f32.mxu0 %vm6941_vm11, %v6939_v29 }
 0xdac   :  { %6691 = vmatprep.subr.bf16.mxu0 %v6940_v61 }
 0xdaf   :  { %6693 = vmatpush3.bf16.msra.mxu0 %v7706_v20 }
 0xdb0   :  { %6694 = vmatprep.subr.bf16.mxu0 %v6940_v61 }
 0xe45   :  { %v4578_v1 = vpop.f32.mrb[22].mxu1 }
 0xe46   :  { %v6721_v2 = vadd.f32 %v7714_v26, %v4578_v1  ;;  %v6240_v4 = vpop.f32.mrb[23].mxu1 }
 0xe48   :  { %6851 = vtanh.f32 %v6721_v2 }
 0xe52   :  { %v6852_v7 = vpop.eup %6851 }
 0xe53   :  { %6261 = vmatmul.mubr.msk.f32.vlgmr.msra.gmra.mrb[18].mxu1 %vm301_vm10, %v6852_v7 }
 0xe54   :  { %6304 = vmatprep.mubr.msk.f32.mxu1 %vm6941_vm11, %v6939_v29 }
 0xe7d   :  { %v4652_v23 = vpop.f32.mrb[30].mxu0 }
 0xe7e   :  { %v6728_v5 = vadd.f32 %v7727_v36, %v4652_v23  ;;  %v6251_v8 = vpop.f32.mrb[31].mxu0 }
 0xe80   :  { %6853 = vtanh.f32 %v6728_v5 }
 0xe8a   :  { %v6854_v10 = vpop.eup %6853 }
 0xe8b   :  { %6272 = vmatmul.mubr.msk.f32.vlgmr.msra.gmra.mrb[34].mxu0 %vm301_vm10, %v6854_v10 }
 0xe8c   :  { %6696 = vmatpush3.bf16.msra.mxu0 %v7692_v9  ;;  %6282 = vmatprep.mubr.msk.f32.mxu0 %vm6941_vm11, %v6939_v29 }
 0xe8d   :  { %6697 = vmatprep.subr.bf16.mxu0 %v6940_v61 }
 0xe90   :  { %6699 = vmatpush3.bf16.msra.mxu0 %v7698_v11 }
 0xe91   :  { %6700 = vmatprep.subr.bf16.mxu0 %v6940_v61 }
 0xf26   :  { %v4728_v12 = vpop.f32.mrb[18].mxu1 }
 0xf27   :  { %v6719_v14 = vadd.f32 %v7714_v26, %v4728_v12  ;;  %v6262_v15 = vpop.f32.mrb[19].mxu1 }
 0xf29   :  { %6855 = vtanh.f32 %v6719_v14 }
 0xf33   :  { %v6856_v18 = vpop.eup %6855 }
 0xf34   :  { %6283 = vmatmul.mubr.msk.f32.vlgmr.msra.gmra.mrb[8].mxu0 %vm301_vm10, %v6856_v18 }
 0xf35   :  { %6702 = vmatpush3.bf16.msra.mxu0 %v7703_v16  ;;  %6293 = vmatprep.mubr.msk.f32.mxu0 %vm6941_vm11, %v6939_v29  ;;  %v4964_v16 = vld [vmem:[%s7879_s17 + $0x8] sm:$0xff] }
 0xf36   :  { %6703 = vmatprep.subr.bf16.mxu0 %v6940_v61  ;;  %v6707_v13 = vpack.c.bf16 %v4964_v16, %v4963_v28 }
 0xf38   :  { %6708 = vmatpush3.bf16.msra.mxu1 %v6707_v13 }
 0xf39   :  { %6705 = vmatpush3.bf16.msra.mxu0 %v7706_v20  ;;  %v4965_v20 = vld [vmem:[%s7879_s17 + $0x10] sm:$0xff]  ;;  %6709 = vmatprep.subr.bf16.mxu1 %v6940_v61 }
 0xf3a   :  { %v6710_v33 = vpack.c.bf16 %v4966_v31, %v4965_v20 }
 0xf3c   :  { %6711 = vmatpush3.bf16.msra.mxu1 %v6710_v33 }
 0xf3d   :  { %6712 = vmatprep.subr.bf16.mxu1 %v6940_v61 }
 0xf5e   :  { %v4802_v9 = vpop.f32.mrb[34].mxu0 }
 0xf5f   :  { %v6730_v11 = vadd.f32 %v7727_v36, %v4802_v9  ;;  %v6273_v22 = vpop.f32.mrb[35].mxu0 }
 0xf61   :  { %6857 = vtanh.f32 %v6730_v11 }
 0xf6b   :  { %v6858_v25 = vpop.eup %6857 }
 0xf6c   :  { %6294 = vmatmul.mubr.msk.f32.vlgmr.msra.gmra.mrb[38].mxu0 %vm301_vm10, %v6858_v25 }
0x1007   :  { %v4878_v35 = vpop.f32.mrb[8].mxu0 }
0x1008   :  { %v6284_v37 = vpop.f32.mrb[9].mxu0  ;;  %v6718_v32 = vadd.f32 %v7714_v26, %v4878_v35 }
0x103f   :  { %v4952_v38 = vpop.f32.mrb[38].mxu0 }
0x1040   :  { %v6731_v39 = vadd.f32 %v7727_v36, %v4952_v38  ;;  %v6295_v19 = vpop.f32.mrb[39].mxu0  ;;  %v4962_v36 = vld [vmem:[%s7878_s16 + $0x18] sm:$0xff] }
0x1041   :  { %v6716_v26 = vpack.c.bf16 %v4962_v36, %v4961_v42 }
0x1042   :  { %6859 = vtanh.f32 %v6731_v39 }
0x1043   :  { %6861 = vtanh.f32 %v6718_v32 }
0x104c   :  { %v6860_v43 = vpop.eup %6859 }
0x104d   :  { %6305 = vmatmul.mubr.msk.f32.vlgmr.msra.gmra.mrb[48].mxu1 %vm301_vm10, %v6860_v43  ;;  %v6862_v44 = vpop.eup %6861 }
0x104e   :  { %6714 = vmatpush3.bf16.msra.mxu1 %v6713_v41  ;;  %6315 = vmatprep.mubr.msk.f32.mxu1 %vm6941_vm11, %v6939_v29 }
0x104f   :  { %6715 = vmatprep.subr.bf16.mxu1 %v6940_v61 }
0x1052   :  { %6717 = vmatpush3.bf16.msra.mxu1 %v6716_v26 }
0x1055   :  { %6316 = vmatmul.mubr.msk.f32.vlgmr.msra.gmra.mrb[50].mxu1 %vm301_vm10, %v6862_v44 }
0x1120   :  { %v5036_v46 = vpop.f32.mrb[48].mxu1 }
0x1121   :  { %v6306_v17 = vpop.f32.mrb[49].mxu1 }
0x1128   :  { %v5109_v34 = vpop.f32.mrb[50].mxu1 }
0x1129   :  { %v5110_v48 = vadd.f32 %v5109_v34, %v5036_v46  ;;  %v6317_v50 = vpop.f32.mrb[51].mxu1 }
0x112b   :  { %v5120_v51 = vadd.f32 %v5220_v47, %v5110_v48 }
0x112d   :  { %5122 = vst.msk [vmem:[%s7881_s19] sm:$0xff] %vm5121_vm12, %v5120_v51 }
0x112e   :  { %5127 = vsyncpa [#allocation3], 1 }
0x112f   :  { %5128 = vsyncpa [#allocation5], 1 }

</bundles_post_ra>
